<compile_context>
chip_gen: v6e
topology: v6e:2x2x1
jax: 0.10.0
libtpu: 0.0.40
codegen_flags: <defaults>
</compile_context>

<pallas_src>
import functools

import jax
import jax.numpy as jnp
from jax.experimental import pallas as pl
from jax.experimental.pallas import tpu as pltpu

# Synthetic backbone dimensions (stand-in for the timm backbone).
NUM_CLASSES = 10
NC_PAD = 128        # lane-dense head output; sliced back to 10 in the wrapper
CIN = 3             # RGB input
CIN_PAD = 8         # zero-padded input channels (MXU K dim / lane dim of conv LHS)
CMID = 128          # conv width, multiple of 128 (lane-dense)
KH = KW = 3


# -----------------------------------------------------------------------------
# Fused kernel: conv3x3 (9 shifted dots) + bias + ReLU + global-avg-pool + FC head
#   grid = (B, H // TH)   ("parallel", "arbitrary")
# -----------------------------------------------------------------------------
def fused_backbone_kernel(x_ref, wc_ref, bc_ref, wf_ref, bf_ref, o_ref, acc_ref,
                          *, TH, H, W):
    t = pl.program_id(1)                      # row-tile index (reduction axis)

    @pl.when(t == 0)
    def _init():
        acc_ref[...] = jnp.zeros_like(acc_ref)

    r0 = pl.multiple_of(t * TH, TH)           # first output row of this tile

    # Conv as 9 shifted matmuls: (TH*W, CIN_PAD) x (CIN_PAD, CMID), f32 accumulation.
    conv = jnp.zeros((TH * W, CMID), jnp.float32)
    for di in range(KH):
        for dj in range(KW):
            win = x_ref[0, pl.ds(r0 + di, TH), pl.ds(dj, W), :]     # (TH, W, CIN_PAD) f32
            lhs = win.reshape(TH * W, CIN_PAD).astype(jnp.bfloat16)  # bf16 MXU operand
            conv = conv + jnp.dot(lhs, wc_ref[di * KW + dj],
                                  preferred_element_type=jnp.float32)

    conv = jnp.maximum(conv + bc_ref[...], 0.0)                      # bias + ReLU (f32)

    # Running spatial sum for the global average pool (never written to HBM).
    acc_ref[...] += jnp.sum(conv, axis=0, keepdims=True)             # (1, CMID)

    @pl.when(t == pl.num_programs(1) - 1)
    def _finalize():
        pooled = acc_ref[...] * (1.0 / (H * W))                      # (1, CMID)
        logits = jnp.dot(pooled, wf_ref[...],
                         preferred_element_type=jnp.float32) + bf_ref[...]
        o_ref[...] = logits.reshape(1, 1, NC_PAD)


def fused_backbone(x_pad, w_conv, b_conv, w_fc, b_fc, *, H, W, TH):
    B, Hp, Wp, C = x_pad.shape
    assert H % TH == 0
    n_row_tiles = H // TH

    kernel = functools.partial(fused_backbone_kernel, TH=TH, H=H, W=W)
    out = pl.pallas_call(
        kernel,
        out_shape=jax.ShapeDtypeStruct((B, 1, NC_PAD), jnp.float32),
        grid_spec=pltpu.PrefetchScalarGridSpec(
            num_scalar_prefetch=0,
            grid=(B, n_row_tiles),
            in_specs=[
                # padded NHWC activation: per-batch block, resident across row tiles
                pl.BlockSpec((1, Hp, Wp, C), lambda b, t: (b, 0, 0, 0)),
                # conv weights (9, CIN_PAD, CMID) bf16, VMEM-resident
                pl.BlockSpec((KH * KW, CIN_PAD, CMID), lambda b, t: (0, 0, 0)),
                # conv bias (1, CMID) f32
                pl.BlockSpec((1, CMID), lambda b, t: (0, 0)),
                # head weight (CMID, NC_PAD) f32
                pl.BlockSpec((CMID, NC_PAD), lambda b, t: (0, 0)),
                # head bias (1, NC_PAD) f32
                pl.BlockSpec((1, NC_PAD), lambda b, t: (0, 0)),
            ],
            out_specs=pl.BlockSpec((1, 1, NC_PAD), lambda b, t: (b, 0, 0)),
            scratch_shapes=[pltpu.VMEM((1, CMID), jnp.float32)],
        ),
        compiler_params=pltpu.CompilerParams(
            dimension_semantics=("parallel", "arbitrary"),
            vmem_limit_bytes=32 * 1024 * 1024,
        ),
    )(x_pad, w_conv, b_conv, w_fc, b_fc)

    return out[:, 0, :NUM_CLASSES]


# -----------------------------------------------------------------------------
# Parameters (synthetic backbone) — padded to lane-dense shapes, zero-filled pads
# -----------------------------------------------------------------------------
def init_params(key):
    k1, k2, k3, k4 = jax.random.split(key, 4)
    # conv weight in PyTorch layout (Cout, Cin, 3, 3)
    w_conv = jax.random.normal(k1, (CMID, CIN, KH, KW), jnp.float32) * 0.1
    b_conv = jax.random.normal(k2, (CMID,), jnp.float32) * 0.01
    w_fc = jax.random.normal(k3, (CMID, NUM_CLASSES), jnp.float32) * 0.1
    b_fc = jax.random.normal(k4, (NUM_CLASSES,), jnp.float32) * 0.01

    # (Cout, Cin, KH, KW) -> (KH, KW, Cin, Cout), zero-pad Cin -> (9, CIN_PAD, CMID) bf16
    w = jnp.transpose(w_conv, (2, 3, 1, 0))
    w = jnp.pad(w, ((0, 0), (0, 0), (0, CIN_PAD - CIN), (0, 0)))
    w = w.reshape(KH * KW, CIN_PAD, CMID).astype(jnp.bfloat16)

    # head: zero-pad classes to NC_PAD (padded logits are sliced off in the wrapper)
    w_fc_p = jnp.pad(w_fc, ((0, 0), (0, NC_PAD - NUM_CLASSES)))
    b_fc_p = jnp.pad(b_fc, ((0, NC_PAD - NUM_CLASSES),)).reshape(1, NC_PAD)

    return {
        "w_conv": w,
        "b_conv": b_conv.reshape(1, CMID),
        "w_fc": w_fc_p,
        "b_fc": b_fc_p,
    }


# -----------------------------------------------------------------------------
# Forward wrapper (NCHW in, logits (B, 10) out) — layout plumbing only, no im2col
# -----------------------------------------------------------------------------
@functools.partial(jax.jit, static_argnames=("row_tile",))
def custom_model_forward(x_nchw, params, row_tile=8):
    x = jnp.transpose(x_nchw, (0, 2, 3, 1)).astype(jnp.float32)      # NCHW -> NHWC
    B, H, W, C = x.shape
    # conv pad=1 spatially, zero-pad channels to CIN_PAD (lane/K dim)
    x_pad = jnp.pad(x, ((0, 0), (1, 1), (1, 1), (0, CIN_PAD - C)))
    return fused_backbone(x_pad, params["w_conv"], params["b_conv"],
                          params["w_fc"], params["b_fc"],
                          H=H, W=W, TH=row_tile)


# Pure-JAX reference (same dtypes / padding) for a numerical sanity check.
def reference_forward(x_nchw, params):
    x = jnp.transpose(x_nchw, (0, 2, 3, 1)).astype(jnp.float32)
    B, H, W, C = x.shape
    xp = jnp.pad(x, ((0, 0), (1, 1), (1, 1), (0, CIN_PAD - C)))
    w = params["w_conv"]                                             # (9, CIN_PAD, CMID) bf16
    conv = jnp.zeros((B, H, W, CMID), jnp.float32)
    for di in range(KH):
        for dj in range(KW):
            win = xp[:, di:di + H, dj:dj + W, :].astype(jnp.bfloat16)
            conv = conv + jnp.einsum("bhwc,cn->bhwn", win, w[di * KW + dj],
                                     preferred_element_type=jnp.float32)
    conv = jnp.maximum(conv + params["b_conv"][0], 0.0)
    pooled = conv.mean(axis=(1, 2))                                  # (B, CMID)
    logits = pooled @ params["w_fc"] + params["b_fc"]
    return logits[:, :NUM_CLASSES]


# TODO(synk): the actual timm backbone (args.backbone_name, pretrained weights) has
# no in-script equivalent; a synthetic conv3x3 -> GAP -> linear(10) backbone with the
# same num_classes=10 head is implemented instead.

if __name__ == "__main__":
    key = jax.random.PRNGKey(0)
    kx, kp = jax.random.split(key)
    x = jax.random.normal(kx, (2, CIN, 16, 16), jnp.float32)         # NCHW, like PyTorch
    params = init_params(kp)

    out = custom_model_forward(x, params)
    jax.block_until_ready(out)
    assert out.shape == (2, NUM_CLASSES), out.shape

    ref = reference_forward(x, params)
    assert jnp.allclose(out, ref, atol=1e-2, rtol=1e-2), (out, ref)

    print("KERNEL_OK")
</pallas_src>

<mosaic_0001>
module attributes {stable_mosaic.version = 11 : i64} {
  func.func @fused_backbone_kernel(%arg0: i32, %arg1: i32, %arg2: memref<1x18x18x8xf32, #tpu.memory_space<vmem>>, %arg3: memref<9x8x128xbf16, #tpu.memory_space<vmem>>, %arg4: memref<1x128xf32, #tpu.memory_space<vmem>>, %arg5: memref<128x128xf32, #tpu.memory_space<vmem>>, %arg6: memref<1x128xf32, #tpu.memory_space<vmem>>, %arg7: memref<1x1x128xf32, #tpu.memory_space<vmem>>, %arg8: memref<1x128xf32, #tpu.memory_space<vmem>>) attributes {dimension_semantics = [#tpu.dimension_semantics<parallel>, #tpu.dimension_semantics<arbitrary>], iteration_bounds = array<i64: 2, 2>, scalar_prefetch = 0 : i64, scratch_operands = 1 : i64, tpu.core_type = #tpu.core_type<tc>, window_params = [{transform_indices = @transform_0, window_bounds = array<i64: 1, 18, 18, 8>}, {pipeline_mode = #tpu.pipeline_mode<synchronous>, transform_indices = @transform_1, window_bounds = array<i64: 9, 8, 128>}, {pipeline_mode = #tpu.pipeline_mode<synchronous>, transform_indices = @transform_2, window_bounds = array<i64: 1, 128>}, {pipeline_mode = #tpu.pipeline_mode<synchronous>, transform_indices = @transform_3, window_bounds = array<i64: 128, 128>}, {pipeline_mode = #tpu.pipeline_mode<synchronous>, transform_indices = @transform_4, window_bounds = array<i64: 1, 128>}, {transform_indices = @transform_5, window_bounds = array<i64: 1, 1, 128>}]} {
    %c0_i32 = arith.constant 0 : i32
    %0 = arith.cmpi eq, %arg1, %c0_i32 : i32
    %1 = arith.extui %0 : i1 to i32
    %c0_i32_0 = arith.constant 0 : i32
    %2 = arith.cmpi ne, %1, %c0_i32_0 : i32
    scf.if %2 {
      %cst_72 = arith.constant 0.000000e+00 : f32
      %109 = vector.broadcast %cst_72 : f32 to vector<1x128xf32>
      %c0_73 = arith.constant 0 : index
      %c0_74 = arith.constant 0 : index
      %110 = vector.load %arg8[%c0_73, %c0_74] : memref<1x128xf32, #tpu.memory_space<vmem>>, vector<1x128xf32>
      tpu.vector_store %arg8[%c0_73, %c0_74], %109 {strides = array<i32>} : memref<1x128xf32, #tpu.memory_space<vmem>>, vector<1x128xf32>,
    } else {
    }
    %c8_i32 = arith.constant 8 : i32
    %3 = arith.muli %arg1, %c8_i32 : i32
    %4 = tpu.assume_multiple %3, 8 : i32
    %cst = arith.constant 0.000000e+00 : f32
    %5 = vector.broadcast %cst : f32 to vector<128x128xf32>
    %c0_i32_1 = arith.constant 0 : i32
    %6 = arith.addi %4, %c0_i32_1 : i32
    %c0 = arith.constant 0 : index
    %7 = arith.index_cast %6 : i32 to index
    %c0_2 = arith.constant 0 : index
    %c0_3 = arith.constant 0 : index
    %8 = vector.load %arg2[%c0, %7, %c0_2, %c0_3] : memref<1x18x18x8xf32, #tpu.memory_space<vmem>>, vector<1x8x16x8xf32>
    %9 = vector.shape_cast %8 : vector<1x8x16x8xf32> to vector<8x16x8xf32>
    %10 = vector.shape_cast %9 : vector<8x16x8xf32> to vector<128x8xf32>
    %11 = arith.truncf %10 : vector<128x8xf32> to vector<128x8xbf16>
    %c0_4 = arith.constant 0 : index
    %c0_5 = arith.constant 0 : index
    %c0_6 = arith.constant 0 : index
    %12 = vector.load %arg3[%c0_4, %c0_5, %c0_6] : memref<9x8x128xbf16, #tpu.memory_space<vmem>>, vector<1x8x128xbf16>
    %13 = vector.shape_cast %12 : vector<1x8x128xbf16> to vector<8x128xbf16>
    %cst_7 = arith.constant dense<0.000000e+00> : vector<128x128xf32>
    %14 = tpu.matmul %11, %13, %cst_7 {dimension_numbers = #tpu.dot_dimension_numbers<[1], [0], [0], [1], [0, 0, 1, 1], [], []>} : vector<128x8xbf16>, vector<8x128xbf16>, vector<128x128xf32> -> vector<128x128xf32>
    %15 = arith.addf %5, %14 : vector<128x128xf32>
    %c0_i32_8 = arith.constant 0 : i32
    %16 = arith.addi %4, %c0_i32_8 : i32
    %c0_9 = arith.constant 0 : index
    %17 = arith.index_cast %16 : i32 to index
    %c1 = arith.constant 1 : index
    %c0_10 = arith.constant 0 : index
    %18 = vector.load %arg2[%c0_9, %17, %c1, %c0_10] : memref<1x18x18x8xf32, #tpu.memory_space<vmem>>, vector<1x8x16x8xf32>
    %19 = vector.shape_cast %18 : vector<1x8x16x8xf32> to vector<8x16x8xf32>
    %20 = vector.shape_cast %19 : vector<8x16x8xf32> to vector<128x8xf32>
    %21 = arith.truncf %20 : vector<128x8xf32> to vector<128x8xbf16>
    %c1_11 = arith.constant 1 : index
    %c0_12 = arith.constant 0 : index
    %c0_13 = arith.constant 0 : index
    %22 = vector.load %arg3[%c1_11, %c0_12, %c0_13] : memref<9x8x128xbf16, #tpu.memory_space<vmem>>, vector<1x8x128xbf16>
    %23 = vector.shape_cast %22 : vector<1x8x128xbf16> to vector<8x128xbf16>
    %cst_14 = arith.constant dense<0.000000e+00> : vector<128x128xf32>
    %24 = tpu.matmul %21, %23, %cst_14 {dimension_numbers = #tpu.dot_dimension_numbers<[1], [0], [0], [1], [0, 0, 1, 1], [], []>} : vector<128x8xbf16>, vector<8x128xbf16>, vector<128x128xf32> -> vector<128x128xf32>
    %25 = arith.addf %15, %24 : vector<128x128xf32>
    %c0_i32_15 = arith.constant 0 : i32
    %26 = arith.addi %4, %c0_i32_15 : i32
    %c0_16 = arith.constant 0 : index
    %27 = arith.index_cast %26 : i32 to index
    %c2 = arith.constant 2 : index
    %c0_17 = arith.constant 0 : index
    %28 = vector.load %arg2[%c0_16, %27, %c2, %c0_17] : memref<1x18x18x8xf32, #tpu.memory_space<vmem>>, vector<1x8x16x8xf32>
    %29 = vector.shape_cast %28 : vector<1x8x16x8xf32> to vector<8x16x8xf32>
    %30 = vector.shape_cast %29 : vector<8x16x8xf32> to vector<128x8xf32>
    %31 = arith.truncf %30 : vector<128x8xf32> to vector<128x8xbf16>
    %c2_18 = arith.constant 2 : index
    %c0_19 = arith.constant 0 : index
    %c0_20 = arith.constant 0 : index
    %32 = vector.load %arg3[%c2_18, %c0_19, %c0_20] : memref<9x8x128xbf16, #tpu.memory_space<vmem>>, vector<1x8x128xbf16>
    %33 = vector.shape_cast %32 : vector<1x8x128xbf16> to vector<8x128xbf16>
    %cst_21 = arith.constant dense<0.000000e+00> : vector<128x128xf32>
    %34 = tpu.matmul %31, %33, %cst_21 {dimension_numbers = #tpu.dot_dimension_numbers<[1], [0], [0], [1], [0, 0, 1, 1], [], []>} : vector<128x8xbf16>, vector<8x128xbf16>, vector<128x128xf32> -> vector<128x128xf32>
    %35 = arith.addf %25, %34 : vector<128x128xf32>
    %c1_i32 = arith.constant 1 : i32
    %36 = arith.addi %4, %c1_i32 : i32
    %c0_22 = arith.constant 0 : index
    %37 = arith.index_cast %36 : i32 to index
    %c0_23 = arith.constant 0 : index
    %c0_24 = arith.constant 0 : index
    %38 = vector.load %arg2[%c0_22, %37, %c0_23, %c0_24] : memref<1x18x18x8xf32, #tpu.memory_space<vmem>>, vector<1x8x16x8xf32>
    %39 = vector.shape_cast %38 : vector<1x8x16x8xf32> to vector<8x16x8xf32>
    %40 = vector.shape_cast %39 : vector<8x16x8xf32> to vector<128x8xf32>
    %41 = arith.truncf %40 : vector<128x8xf32> to vector<128x8xbf16>
    %c3 = arith.constant 3 : index
    %c0_25 = arith.constant 0 : index
    %c0_26 = arith.constant 0 : index
    %42 = vector.load %arg3[%c3, %c0_25, %c0_26] : memref<9x8x128xbf16, #tpu.memory_space<vmem>>, vector<1x8x128xbf16>
    %43 = vector.shape_cast %42 : vector<1x8x128xbf16> to vector<8x128xbf16>
    %cst_27 = arith.constant dense<0.000000e+00> : vector<128x128xf32>
    %44 = tpu.matmul %41, %43, %cst_27 {dimension_numbers = #tpu.dot_dimension_numbers<[1], [0], [0], [1], [0, 0, 1, 1], [], []>} : vector<128x8xbf16>, vector<8x128xbf16>, vector<128x128xf32> -> vector<128x128xf32>
    %45 = arith.addf %35, %44 : vector<128x128xf32>
    %c1_i32_28 = arith.constant 1 : i32
    %46 = arith.addi %4, %c1_i32_28 : i32
    %c0_29 = arith.constant 0 : index
    %47 = arith.index_cast %46 : i32 to index
    %c1_30 = arith.constant 1 : index
    %c0_31 = arith.constant 0 : index
    %48 = vector.load %arg2[%c0_29, %47, %c1_30, %c0_31] : memref<1x18x18x8xf32, #tpu.memory_space<vmem>>, vector<1x8x16x8xf32>
    %49 = vector.shape_cast %48 : vector<1x8x16x8xf32> to vector<8x16x8xf32>
    %50 = vector.shape_cast %49 : vector<8x16x8xf32> to vector<128x8xf32>
    %51 = arith.truncf %50 : vector<128x8xf32> to vector<128x8xbf16>
    %c4 = arith.constant 4 : index
    %c0_32 = arith.constant 0 : index
    %c0_33 = arith.constant 0 : index
    %52 = vector.load %arg3[%c4, %c0_32, %c0_33] : memref<9x8x128xbf16, #tpu.memory_space<vmem>>, vector<1x8x128xbf16>
    %53 = vector.shape_cast %52 : vector<1x8x128xbf16> to vector<8x128xbf16>
    %cst_34 = arith.constant dense<0.000000e+00> : vector<128x128xf32>
    %54 = tpu.matmul %51, %53, %cst_34 {dimension_numbers = #tpu.dot_dimension_numbers<[1], [0], [0], [1], [0, 0, 1, 1], [], []>} : vector<128x8xbf16>, vector<8x128xbf16>, vector<128x128xf32> -> vector<128x128xf32>
    %55 = arith.addf %45, %54 : vector<128x128xf32>
    %c1_i32_35 = arith.constant 1 : i32
    %56 = arith.addi %4, %c1_i32_35 : i32
    %c0_36 = arith.constant 0 : index
    %57 = arith.index_cast %56 : i32 to index
    %c2_37 = arith.constant 2 : index
    %c0_38 = arith.constant 0 : index
    %58 = vector.load %arg2[%c0_36, %57, %c2_37, %c0_38] : memref<1x18x18x8xf32, #tpu.memory_space<vmem>>, vector<1x8x16x8xf32>
    %59 = vector.shape_cast %58 : vector<1x8x16x8xf32> to vector<8x16x8xf32>
    %60 = vector.shape_cast %59 : vector<8x16x8xf32> to vector<128x8xf32>
    %61 = arith.truncf %60 : vector<128x8xf32> to vector<128x8xbf16>
    %c5 = arith.constant 5 : index
    %c0_39 = arith.constant 0 : index
    %c0_40 = arith.constant 0 : index
    %62 = vector.load %arg3[%c5, %c0_39, %c0_40] : memref<9x8x128xbf16, #tpu.memory_space<vmem>>, vector<1x8x128xbf16>
    %63 = vector.shape_cast %62 : vector<1x8x128xbf16> to vector<8x128xbf16>
    %cst_41 = arith.constant dense<0.000000e+00> : vector<128x128xf32>
    %64 = tpu.matmul %61, %63, %cst_41 {dimension_numbers = #tpu.dot_dimension_numbers<[1], [0], [0], [1], [0, 0, 1, 1], [], []>} : vector<128x8xbf16>, vector<8x128xbf16>, vector<128x128xf32> -> vector<128x128xf32>
    %65 = arith.addf %55, %64 : vector<128x128xf32>
    %c2_i32 = arith.constant 2 : i32
    %66 = arith.addi %4, %c2_i32 : i32
    %c0_42 = arith.constant 0 : index
    %67 = arith.index_cast %66 : i32 to index
    %c0_43 = arith.constant 0 : index
    %c0_44 = arith.constant 0 : index
    %68 = vector.load %arg2[%c0_42, %67, %c0_43, %c0_44] : memref<1x18x18x8xf32, #tpu.memory_space<vmem>>, vector<1x8x16x8xf32>
    %69 = vector.shape_cast %68 : vector<1x8x16x8xf32> to vector<8x16x8xf32>
    %70 = vector.shape_cast %69 : vector<8x16x8xf32> to vector<128x8xf32>
    %71 = arith.truncf %70 : vector<128x8xf32> to vector<128x8xbf16>
    %c6 = arith.constant 6 : index
    %c0_45 = arith.constant 0 : index
    %c0_46 = arith.constant 0 : index
    %72 = vector.load %arg3[%c6, %c0_45, %c0_46] : memref<9x8x128xbf16, #tpu.memory_space<vmem>>, vector<1x8x128xbf16>
    %73 = vector.shape_cast %72 : vector<1x8x128xbf16> to vector<8x128xbf16>
    %cst_47 = arith.constant dense<0.000000e+00> : vector<128x128xf32>
    %74 = tpu.matmul %71, %73, %cst_47 {dimension_numbers = #tpu.dot_dimension_numbers<[1], [0], [0], [1], [0, 0, 1, 1], [], []>} : vector<128x8xbf16>, vector<8x128xbf16>, vector<128x128xf32> -> vector<128x128xf32>
    %75 = arith.addf %65, %74 : vector<128x128xf32>
    %c2_i32_48 = arith.constant 2 : i32
    %76 = arith.addi %4, %c2_i32_48 : i32
    %c0_49 = arith.constant 0 : index
    %77 = arith.index_cast %76 : i32 to index
    %c1_50 = arith.constant 1 : index
    %c0_51 = arith.constant 0 : index
    %78 = vector.load %arg2[%c0_49, %77, %c1_50, %c0_51] : memref<1x18x18x8xf32, #tpu.memory_space<vmem>>, vector<1x8x16x8xf32>
    %79 = vector.shape_cast %78 : vector<1x8x16x8xf32> to vector<8x16x8xf32>
    %80 = vector.shape_cast %79 : vector<8x16x8xf32> to vector<128x8xf32>
    %81 = arith.truncf %80 : vector<128x8xf32> to vector<128x8xbf16>
    %c7 = arith.constant 7 : index
    %c0_52 = arith.constant 0 : index
    %c0_53 = arith.constant 0 : index
    %82 = vector.load %arg3[%c7, %c0_52, %c0_53] : memref<9x8x128xbf16, #tpu.memory_space<vmem>>, vector<1x8x128xbf16>
    %83 = vector.shape_cast %82 : vector<1x8x128xbf16> to vector<8x128xbf16>
    %cst_54 = arith.constant dense<0.000000e+00> : vector<128x128xf32>
    %84 = tpu.matmul %81, %83, %cst_54 {dimension_numbers = #tpu.dot_dimension_numbers<[1], [0], [0], [1], [0, 0, 1, 1], [], []>} : vector<128x8xbf16>, vector<8x128xbf16>, vector<128x128xf32> -> vector<128x128xf32>
    %85 = arith.addf %75, %84 : vector<128x128xf32>
    %c2_i32_55 = arith.constant 2 : i32
    %86 = arith.addi %4, %c2_i32_55 : i32
    %c0_56 = arith.constant 0 : index
    %87 = arith.index_cast %86 : i32 to index
    %c2_57 = arith.constant 2 : index
    %c0_58 = arith.constant 0 : index
    %88 = vector.load %arg2[%c0_56, %87, %c2_57, %c0_58] : memref<1x18x18x8xf32, #tpu.memory_space<vmem>>, vector<1x8x16x8xf32>
    %89 = vector.shape_cast %88 : vector<1x8x16x8xf32> to vector<8x16x8xf32>
    %90 = vector.shape_cast %89 : vector<8x16x8xf32> to vector<128x8xf32>
    %91 = arith.truncf %90 : vector<128x8xf32> to vector<128x8xbf16>
    %c8 = arith.constant 8 : index
    %c0_59 = arith.constant 0 : index
    %c0_60 = arith.constant 0 : index
    %92 = vector.load %arg3[%c8, %c0_59, %c0_60] : memref<9x8x128xbf16, #tpu.memory_space<vmem>>, vector<1x8x128xbf16>
    %93 = vector.shape_cast %92 : vector<1x8x128xbf16> to vector<8x128xbf16>
    %cst_61 = arith.constant dense<0.000000e+00> : vector<128x128xf32>
    %94 = tpu.matmul %91, %93, %cst_61 {dimension_numbers = #tpu.dot_dimension_numbers<[1], [0], [0], [1], [0, 0, 1, 1], [], []>} : vector<128x8xbf16>, vector<8x128xbf16>, vector<128x128xf32> -> vector<128x128xf32>
    %95 = arith.addf %85, %94 : vector<128x128xf32>
    %c0_62 = arith.constant 0 : index
    %c0_63 = arith.constant 0 : index
    %96 = vector.load %arg4[%c0_62, %c0_63] : memref<1x128xf32, #tpu.memory_space<vmem>>, vector<1x128xf32>
    %97 = vector.broadcast %96 : vector<1x128xf32> to vector<128x128xf32>
    %98 = arith.addf %95, %97 : vector<128x128xf32>
    %cst_64 = arith.constant 0.000000e+00 : f32
    %99 = vector.broadcast %cst_64 : f32 to vector<128x128xf32>
    %100 = arith.maximumf %98, %99 : vector<128x128xf32>
    %c0_65 = arith.constant 0 : index
    %c0_66 = arith.constant 0 : index
    %101 = vector.load %arg8[%c0_65, %c0_66] : memref<1x128xf32, #tpu.memory_space<vmem>>, vector<1x128xf32>
    %cst_67 = arith.constant dense<0.000000e+00> : vector<128xf32>
    %102 = vector.multi_reduction <add>, %100, %cst_67 [0] : vector<128x128xf32> to vector<128xf32>
    %103 = vector.shape_cast %102 : vector<128xf32> to vector<1x128xf32>
    %104 = arith.addf %101, %103 : vector<1x128xf32>
    %c0_68 = arith.constant 0 : index
    %c0_69 = arith.constant 0 : index
    %105 = vector.load %arg8[%c0_68, %c0_69] : memref<1x128xf32, #tpu.memory_space<vmem>>, vector<1x128xf32>
    tpu.vector_store %arg8[%c0_68, %c0_69], %104 {strides = array<i32>} : memref<1x128xf32, #tpu.memory_space<vmem>>, vector<1x128xf32>,
    %c1_i32_70 = arith.constant 1 : i32
    %106 = arith.cmpi eq, %arg1, %c1_i32_70 : i32
    %107 = arith.extui %106 : i1 to i32
    %c0_i32_71 = arith.constant 0 : i32
    %108 = arith.cmpi ne, %107, %c0_i32_71 : i32
    scf.if %108 {
      %c0_72 = arith.constant 0 : index
      %c0_73 = arith.constant 0 : index
      %109 = vector.load %arg8[%c0_72, %c0_73] : memref<1x128xf32, #tpu.memory_space<vmem>>, vector<1x128xf32>
      %cst_74 = arith.constant 3.906250e-03 : f32
      %110 = vector.broadcast %cst_74 : f32 to vector<1x128xf32>
      %111 = arith.mulf %109, %110 : vector<1x128xf32>
      %c0_75 = arith.constant 0 : index
      %c0_76 = arith.constant 0 : index
      %112 = vector.load %arg5[%c0_75, %c0_76] : memref<128x128xf32, #tpu.memory_space<vmem>>, vector<128x128xf32>
      %cst_77 = arith.constant dense<0.000000e+00> : vector<1x128xf32>
      %113 = tpu.matmul %111, %112, %cst_77 {dimension_numbers = #tpu.dot_dimension_numbers<[1], [0], [0], [1], [0, 0, 1, 1], [], []>} : vector<1x128xf32>, vector<128x128xf32>, vector<1x128xf32> -> vector<1x128xf32>
      %c0_78 = arith.constant 0 : index
      %c0_79 = arith.constant 0 : index
      %114 = vector.load %arg6[%c0_78, %c0_79] : memref<1x128xf32, #tpu.memory_space<vmem>>, vector<1x128xf32>
      %115 = arith.addf %113, %114 : vector<1x128xf32>
      %116 = vector.shape_cast %115 : vector<1x128xf32> to vector<1x1x128xf32>
      %c0_80 = arith.constant 0 : index
      %c0_81 = arith.constant 0 : index
      %c0_82 = arith.constant 0 : index
      %117 = vector.load %arg7[%c0_80, %c0_81, %c0_82] : memref<1x1x128xf32, #tpu.memory_space<vmem>>, vector<1x1x128xf32>
      tpu.vector_store %arg7[%c0_80, %c0_81, %c0_82], %116 {strides = array<i32>} : memref<1x1x128xf32, #tpu.memory_space<vmem>>, vector<1x1x128xf32>,
    } else {
    }
    return
  }
  func.func @transform_0(%arg0: i32, %arg1: i32) -> (i32, i32, i32, i32) {
    %c0_i32 = arith.constant 0 : i32
    %c0_i32_0 = arith.constant 0 : i32
    %c0_i32_1 = arith.constant 0 : i32
    %c0_i32_2 = arith.constant 0 : i32
    return %arg0, %c0_i32, %c0_i32_0, %c0_i32_1 : i32, i32, i32, i32
  }
  func.func @transform_1(%arg0: i32, %arg1: i32) -> (i32, i32, i32) {
    %c0_i32 = arith.constant 0 : i32
    %c0_i32_0 = arith.constant 0 : i32
    %c0_i32_1 = arith.constant 0 : i32
    %c0_i32_2 = arith.constant 0 : i32
    return %c0_i32, %c0_i32_0, %c0_i32_1 : i32, i32, i32
  }
  func.func @transform_2(%arg0: i32, %arg1: i32) -> (i32, i32) {
    %c0_i32 = arith.constant 0 : i32
    %c0_i32_0 = arith.constant 0 : i32
    %c0_i32_1 = arith.constant 0 : i32
    return %c0_i32, %c0_i32_0 : i32, i32
  }
  func.func @transform_3(%arg0: i32, %arg1: i32) -> (i32, i32) {
    %c0_i32 = arith.constant 0 : i32
    %c0_i32_0 = arith.constant 0 : i32
    %c0_i32_1 = arith.constant 0 : i32
    return %c0_i32, %c0_i32_0 : i32, i32
  }
  func.func @transform_4(%arg0: i32, %arg1: i32) -> (i32, i32) {
    %c0_i32 = arith.constant 0 : i32
    %c0_i32_0 = arith.constant 0 : i32
    %c0_i32_1 = arith.constant 0 : i32
    return %c0_i32, %c0_i32_0 : i32, i32
  }
  func.func @transform_5(%arg0: i32, %arg1: i32) -> (i32, i32, i32) {
    %c0_i32 = arith.constant 0 : i32
    %c0_i32_0 = arith.constant 0 : i32
    %c0_i32_1 = arith.constant 0 : i32
    return %arg0, %c0_i32, %c0_i32_0 : i32, i32, i32
  }
}

</mosaic_0001>

<bundles_post_ra>
// kernel: custom_model_forward.1
= control target key start
LH: loop header
LB: loop body
LE: loop exit
PB: predicated region body
PF: predicated region fallthrough
CT: control target
= control target key end

     0   :  { %10 = vsyncpa [#allocation4], 0  ;;  %s3304_s0 = inlined_call_operand.vmem [shape: f32[2,18,18,8], index: 0, kind: input, shape index: {}]   ;;  %s3305_s1 = inlined_call_operand.vmem [shape: bf16[9,8,128], index: 1, kind: input, shape index: {}]   ;;  %s3306_s2 = inlined_call_operand.vmem [shape: f32[1,128], index: 2, kind: input, shape index: {}]   ;;  %s3307_s3 = inlined_call_operand.vmem [shape: f32[128,128], index: 3, kind: input, shape index: {}]   ;;  %s3308_s4 = inlined_call_operand.vmem [shape: f32[1,128], index: 4, kind: input, shape index: {}]   ;;  %s3309_s5 = inlined_call_operand.hbm [shape: f32[2,1,128], index: 5, kind: output, shape index: {}]  }
   0x1   :  { %12 = vsyncpa [#allocation4 + $0x1], 0  ;;  %s2662_s18 = smov 0   ;;  %s2664_s19 = smov 0  }
   0x2   :  { %s2666_s20 = smov 0   ;;  %s2668_s21 = smov 0  }
   0x3   :  { %s2670_s22 = smov 0   ;;  %s2672_s23 = smov 0  }
   0x4   :  { %s2674_s24 = smov 0   ;;  %s2676_s25 = smov 0  }
   0x5 LB: > { %s1958_s26 = sadd.s32 4294967295, %s2626_s25   ;;  %s1959_s27 = sadd.s32 4294967294, %s2626_s25   ;;  %s2626_s25 = sphi %s2676_s25, %s18_s25   ;;  %s2622_s24 = sphi %s2674_s24, %s3350_s24   ;;  %s2618_s23 = sphi %s2672_s23, %s3349_s23   ;;  %s2614_s22 = sphi %s2670_s22, %s3348_s22   ;;  %s2610_s21 = sphi %s2668_s21, %s3347_s21   ;;  %s2606_s20 = sphi %s2666_s20, %s3346_s20   ;;  %s2602_s19 = sphi %s2664_s19, %s3345_s19   ;;  %s2598_s18 = sphi %s2662_s18, %s3344_s18  }
   0x6   : > { %s27_s28 = sadd.s32 1, %s2618_s23  ;;  %s30_s29 = sadd.s32 1, %s2622_s24 }
   0x7   : > { %p28_p0 = scmp.ge.s32.totalorder %s27_s28, 2  ;;  %p157_p1 = scmp.ne.s32.totalorder %s2606_s20, %s2602_s19 }
   0x8   : > { %p158_p2 = scmp.eq.s32.totalorder %s1958_s26, 3  ;;  %p163_p4 = scmp.ne.s32.totalorder %s2602_s19, %s2598_s18 }
   0x9   : > { %s3352_s28 = smov (%p28_p0, %s27_s28), 0  ;;  %s3354_s29 = smov (!%p28_p0, %s30_s29), %s2622_s24 }
   0xa   : > { %p2711_p3 = por %p158_p2, %p157_p1  ;;  %p32_p5 = scmp.ge.s32.totalorder %s3354_s29, 2 }
   0xb   : > { %p164_p6 = scmp.eq.s32.totalorder %s1959_s27, 3  ;;  %p1962_p7 = scmp.ge.s32.totalorder %s2626_s25, 1 }
   0xc   : > { %p202_p8 = scmp.lt.s32.totalorder %s2626_s25, 5  ;;  %s3356_s29 = smov (%p32_p5, %s3354_s29), 0 }
   0xd   : > { %p2721_p9 = por %p164_p6, %p163_p4  ;;  %s144_s7 = ssub.s32 %s2622_s24, %s3356_s29 }
   0xe   : > { %p203_p10 = pnand %p1962_p7, %p202_p8  ;;  %s147_s8 = sadd.s32 1, %s2606_s20 }
   0xf   : > { %p145_p11 = scmp.eq.s32.totalorder %s144_s7, 0 }
  0x10   : > { %206 = sbr.rel (%p203_p10) target bundleno = 656 (0x290), region = 40 }
  0x11   : > { %s2729_s9 = scalar_select %p145_p11, %s2606_s20, %s147_s8  }
  0x15   : > { %s227_s10 = sand.u32 1, %s2602_s19   ;;  %p229_p12 = scmp.lt.s32.totalorder %s2614_s22, 1 }
  0x16   : > { %s2739_s16 = scalar_lea.vmem [#allocation3], %s227_s10  ;;  %p1964_p13 = scmp.ne.s32.totalorder %s2610_s21, 0 }
  0x17   : > { %s230_s11 = scalar_select %p229_p12, %s2614_s22, 1 }
  0x18   : > { %238 = sbr.rel (%p1964_p13) target bundleno = 31 (0x1f), region = 44 }
  0x19   : > { %s2459_s12 = smul.u32 432, %s230_s11 }
  0x1b   : > { %s233_s15 = scalar_lea.vmem %s3304_s0, %s2459_s12 }
  0x1d   : > { %v2628_v0 = vmov 0.0  }
  0x1e   : > { %239 = vst [vmem:[#allocation2] sm:$0x1] %v2628_v0 }
  0x1f PF: > { %v1967_v1 = vld [vmem:[%s3305_s1 + $0x4] sm:$0xf]  ;;  %vm319_vm0 = vcmask 1043456   ;;  %s1966_s27 = smul.u32 192, %s2610_s21  ;;  %v267_v3 = vld [vmem:[%s3305_s1] sm:$0xf] }
  0x20   : > { %2450 = vmatprep.subr.msk.bf16.mxu1 %vm319_vm0, %v1967_v1  ;;  %2449 = vmatprep.subr.msk.bf16.mxu0 %vm319_vm0, %v1967_v1  ;;  %v321_v2 = vsel %vm319_vm0, %v1967_v1, 0  ;;  %v1984_v4 = vld [vmem:[%s3305_s1 + $0x8] sm:$0xf]  ;;  %vm294_vm1 = vcmask 64512   ;;  %v445_v19 = vsel %vm319_vm0, %v267_v3, 0  ;;  %p2148_p0 = scmp.ne.s32.totalorder %s2610_s21, 1 }
  0x21   : > { %2448 = vmatpush3.bf16.msra.mxu1 %v321_v2  ;;  %2251 = vmatpush3.bf16.msra.mxu0 %v321_v2  ;;  %s2755_s13 = scalar_lea.vmem %s233_s15, %s1966_s27  ;;  %v595_v16 = vsel %vm319_vm0, %v1984_v4, 0  ;;  %v2011_v25 = vld [vmem:[%s3305_s1 + $0xc] sm:$0xf]  ;;  %v2036_v26 = vld [vmem:[%s3305_s1 + $0x10] sm:$0xf] }
  0x22   : > { %v268_v5 = vld [vmem:[%s2755_s13 + $0x1] sm:$0xff]  ;;  %v269_v6 = vld [vmem:[%s2755_s13 + $0x9] sm:$0xff]  ;;  %2451 = vmatprep.subr.msk.bf16.mxu1 %vm319_vm0, %v267_v3  ;;  %2452 = vmatprep.subr.msk.bf16.mxu0 %vm319_vm0, %v1984_v4  ;;  %v270_v10 = vld [vmem:[%s2755_s13 + $0x19] sm:$0xff]  ;;  %v930_v49 = vsel %vm319_vm0, %v2036_v26, 0  ;;  %v764_v51 = vsel %vm319_vm0, %v2011_v25, 0 }
  0x23   : > { %v276_v7 = vld [vmem:[%s2755_s13 + $0x61] sm:$0xff]  ;;  %v284_v8 = vpack.c.bf16 %v269_v6, %v268_v5  ;;  %v277_v9 = vld [vmem:[%s2755_s13 + $0x69] sm:$0xff]  ;;  %v278_v14 = vld [vmem:[%s2755_s13 + $0x79] sm:$0xff] }
  0x24   : > { %v271_v11 = vld [vmem:[%s2755_s13 + $0x21] sm:$0xff]  ;;  %v2765_v12 = vpack.c.bf16 %v277_v9, %v276_v7  ;;  %v272_v17 = vld [vmem:[%s2755_s13 + $0x31] sm:$0xff]  ;;  %v273_v20 = vld [vmem:[%s2755_s13 + $0x39] sm:$0xff] }
  0x25   : > { %v2767_v13 = vpack.c.bf16 %v271_v11, %v270_v10  ;;  %v279_v15 = vld [vmem:[%s2755_s13 + $0x81] sm:$0xff]  ;;  %2252 = vmatprep.mubr.msk.bf16.mxu0 %vm294_vm1, %v284_v8  ;;  %v280_v21 = vld [vmem:[%s2755_s13 + $0x91] sm:$0xff]  ;;  %v281_v22 = vld [vmem:[%s2755_s13 + $0x99] sm:$0xff]  ;;  %v2784_v23 = vpack.c.bf16 %v273_v20, %v272_v17 }
  0x26   : > { %v2774_v18 = vpack.c.bf16 %v279_v15, %v278_v14  ;;  %2260 = vmatprep.mubr.msk.bf16.mxu1 %vm294_vm1, %v2765_v12  ;;  %v2786_v24 = vpack.c.bf16 %v281_v22, %v280_v21  ;;  %v274_v27 = vld [vmem:[%s2755_s13 + $0x49] sm:$0xff]  ;;  %v275_v28 = vld [vmem:[%s2755_s13 + $0x51] sm:$0xff]  ;;  %v243_v33 = vld [vmem:[%s2755_s13] sm:$0xff] }
  0x27   : > { %2253 = vmatmul.mubr.msk.bf16.vlgmr.msra.gmra.mxu0 %vm294_vm1, %v2767_v13  ;;  %v282_v29 = vld [vmem:[%s2755_s13 + $0xa9] sm:$0xff]  ;;  %v283_v30 = vld [vmem:[%s2755_s13 + $0xb1] sm:$0xff]  ;;  %v2809_v35 = vpack.c.bf16 %v275_v28, %v274_v27  ;;  %v546_v39 = vld [vmem:[%s2755_s13 + $0x1a] sm:$0xff] }
  0x28   : > { %2261 = vmatmul.mubr.msk.bf16.vlgmr.msra.gmra.mxu1 %vm294_vm1, %v2774_v18  ;;  %2287 = vmatpush3.bf16.msra.mxu0 %v595_v16  ;;  %v544_v31 = vld [vmem:[%s2755_s13 + $0x2] sm:$0xff]  ;;  %v545_v32 = vld [vmem:[%s2755_s13 + $0xa] sm:$0xff]  ;;  %v2812_v36 = vpack.c.bf16 %v283_v30, %v282_v29  ;;  %v245_v41 = vld [vmem:[%s2755_s13 + $0x18] sm:$0xff] }
  0x29   : > { %2269 = vmatpush3.bf16.msra.mxu1 %v445_v19  ;;  %2256 = vmatprep.mubr.msk.bf16.mxu0 %vm294_vm1, %v2784_v23  ;;  %v244_v34 = vld [vmem:[%s2755_s13 + $0x8] sm:$0xff]  ;;  %v560_v37 = vpack.c.bf16 %v545_v32, %v544_v31  ;;  %v246_v42 = vld [vmem:[%s2755_s13 + $0x20] sm:$0xff]  ;;  %v247_v43 = vld [vmem:[%s2755_s13 + $0x30] sm:$0xff] }
  0x2a   : > { %2264 = vmatprep.mubr.msk.bf16.mxu1 %vm294_vm1, %v2786_v24  ;;  %2453 = vmatprep.subr.msk.bf16.mxu1 %vm319_vm0, %v2011_v25  ;;  %v259_v38 = vpack.c.bf16 %v244_v34, %v243_v33  ;;  %v547_v40 = vld [vmem:[%s2755_s13 + $0x22] sm:$0xff]  ;;  %v248_v44 = vld [vmem:[%s2755_s13 + $0x38] sm:$0xff]  ;;  %v260_v48 = vpack.c.bf16 %v246_v42, %v245_v41  ;;  %v2061_v54 = vld [vmem:[%s3305_s1 + $0x14] sm:$0xf] }
  0x2b   : > { %2454 = vmatprep.subr.msk.bf16.mxu0 %vm319_vm0, %v2036_v26  ;;  %v2826_v45 = vpack.c.bf16 %v547_v40, %v546_v39  ;;  %v548_v46 = vld [vmem:[%s2755_s13 + $0x32] sm:$0xff]  ;;  %v549_v47 = vld [vmem:[%s2755_s13 + $0x3a] sm:$0xff]  ;;  %v2831_v50 = vpack.c.bf16 %v248_v44, %v247_v43  ;;  %v249_v53 = vld [vmem:[%s2755_s13 + $0x48] sm:$0xff]  ;;  %v1096_v27 = vsel %vm319_vm0, %v2061_v54, 0 }
  0x2c   : > { %v2834_v52 = vpack.c.bf16 %v549_v47, %v548_v46  ;;  %v550_v55 = vld [vmem:[%s2755_s13 + $0x4a] sm:$0xff]  ;;  %v551_v56 = vld [vmem:[%s2755_s13 + $0x52] sm:$0xff]  ;;  %v552_v59 = vld [vmem:[%s2755_s13 + $0x62] sm:$0xff] }
  0x2d   : > { %v2088_v57 = vld [vmem:[%s3305_s1 + $0x18] sm:$0xf]  ;;  %v250_v58 = vld [vmem:[%s2755_s13 + $0x50] sm:$0xff]  ;;  %v251_v61 = vld [vmem:[%s2755_s13 + $0x60] sm:$0xff]  ;;  %v2858_v63 = vpack.c.bf16 %v551_v56, %v550_v55 }
  0x2e   : > { %v553_v60 = vld [vmem:[%s2755_s13 + $0x6a] sm:$0xff]  ;;  %v2861_v0 = vpack.c.bf16 %v250_v58, %v249_v53  ;;  %v253_v3 = vld [vmem:[%s2755_s13 + $0x78] sm:$0xff]  ;;  %v555_v5 = vld [vmem:[%s2755_s13 + $0x82] sm:$0xff]  ;;  %v1265_v26 = vsel %vm319_vm0, %v2088_v57, 0 }
  0x2f   : > { %2257 = vmatmul.mubr.msk.bf16.gmra.mxu0 %vm294_vm1, %v2809_v35  ;;  %v252_v62 = vld [vmem:[%s2755_s13 + $0x68] sm:$0xff]  ;;  %v2863_v1 = vpack.c.bf16 %v553_v60, %v552_v59  ;;  %v554_v4 = vld [vmem:[%s2755_s13 + $0x7a] sm:$0xff]  ;;  %v556_v7 = vld [vmem:[%s2755_s13 + $0x92] sm:$0xff] }
  0x30   : > { %2265 = vmatmul.mubr.msk.bf16.gmra.mxu1 %vm294_vm1, %v2812_v36  ;;  %2288 = vmatprep.mubr.msk.bf16.mxu0 %vm294_vm1, %v560_v37  ;;  %v2865_v2 = vpack.c.bf16 %v252_v62, %v251_v61  ;;  %v254_v6 = vld [vmem:[%s2755_s13 + $0x80] sm:$0xff]  ;;  %v255_v9 = vld [vmem:[%s2755_s13 + $0x90] sm:$0xff]  ;;  %v256_v10 = vld [vmem:[%s2755_s13 + $0x98] sm:$0xff]  ;;  %v2883_v11 = vpack.c.bf16 %v555_v5, %v554_v4 }
  0x31   : > { %2270 = vmatprep.mubr.msk.bf16.mxu1 %vm294_vm1, %v259_v38  ;;  %v557_v8 = vld [vmem:[%s2755_s13 + $0x9a] sm:$0xff]  ;;  %v264_v14 = vpack.c.bf16 %v254_v6, %v253_v3  ;;  %v265_v16 = vpack.c.bf16 %v256_v10, %v255_v9  ;;  %v558_v17 = vld [vmem:[%s2755_s13 + $0xaa] sm:$0xff]  ;;  %v559_v19 = vld [vmem:[%s2755_s13 + $0xb2] sm:$0xff] }
  0x32   : > { %v2885_v15 = vpack.c.bf16 %v557_v8, %v556_v7  ;;  %v257_v20 = vld [vmem:[%s2755_s13 + $0xa8] sm:$0xff]  ;;  %v258_v21 = vld [vmem:[%s2755_s13 + $0xb0] sm:$0xff]  ;;  %v2897_v22 = vpack.c.bf16 %v559_v19, %v558_v17  ;;  %v2113_v28 = vld [vmem:[%s3305_s1 + $0x1c] sm:$0xf] }
  0x33   : > { %v266_v25 = vpack.c.bf16 %v258_v21, %v257_v20  ;;  %v2034_v29 = vld [vmem:[%s2755_s13 + $0xc1] sm:$0xff]  ;;  %v2035_v30 = vld [vmem:[%s2755_s13 + $0xc9] sm:$0xff]  ;;  %v1431_v38 = vsel %vm319_vm0, %v2113_v28, 0  ;;  %v2086_v39 = vld [vmem:[%s2755_s13 + $0xd8] sm:$0xff] }
  0x34   : > { %v2009_v31 = vld [vmem:[%s2755_s13 + $0xc0] sm:$0xff]  ;;  %v2010_v32 = vld [vmem:[%s2755_s13 + $0xc8] sm:$0xff]  ;;  %v902_v33 = vpack.c.bf16 %v2035_v30, %v2034_v29 }
  0x35   : > { %v736_v34 = vpack.c.bf16 %v2010_v32, %v2009_v31  ;;  %v2087_v40 = vld [vmem:[%s2755_s13 + $0xe0] sm:$0xff]  ;;  %v2060_v42 = vld [vmem:[%s2755_s13 + $0xca] sm:$0xff] }
  0x36   : > { %v2059_v41 = vld [vmem:[%s2755_s13 + $0xc2] sm:$0xff]  ;;  %v1237_v43 = vpack.c.bf16 %v2087_v40, %v2086_v39 }
  0x37   : > { %2289 = vmatmul.mubr.msk.bf16.vlgmr.msra.gmra.mxu0 %vm294_vm1, %v2826_v45  ;;  %v1068_v44 = vpack.c.bf16 %v2060_v42, %v2059_v41 }
  0x38   : > { %2271 = vmatmul.mubr.msk.bf16.vlgmr.msra.gmra.mxu1 %vm294_vm1, %v260_v48  ;;  %2323 = vmatpush3.bf16.msra.mxu0 %v930_v49 }
  0x39   : > { %2305 = vmatpush3.bf16.msra.mxu1 %v764_v51  ;;  %2274 = vmatprep.mubr.msk.bf16.mxu1 %vm294_vm1, %v2831_v50 }
  0x3a   : > { %2292 = vmatprep.mubr.msk.bf16.mxu0 %vm294_vm1, %v2834_v52  ;;  %2455 = vmatprep.subr.msk.bf16.mxu1 %vm319_vm0, %v2061_v54 }
  0x3b   : > { %2456 = vmatprep.subr.msk.bf16.mxu0 %vm319_vm0, %v2088_v57 }
  0x3f   : > { %2293 = vmatmul.mubr.msk.bf16.gmra.mxu0 %vm294_vm1, %v2858_v63 }
  0x40   : > { %2275 = vmatmul.mubr.msk.bf16.gmra.mxu1 %vm294_vm1, %v2861_v0  ;;  %2296 = vmatprep.mubr.msk.bf16.mxu0 %vm294_vm1, %v2863_v1 }
  0x41   : > { %2278 = vmatprep.mubr.msk.bf16.mxu1 %vm294_vm1, %v2865_v2 }
  0x47   : > { %2297 = vmatmul.mubr.msk.bf16.gmra.mxu0 %vm294_vm1, %v2883_v11 }
  0x48   : > { %2279 = vmatmul.mubr.msk.bf16.gmra.mxu1 %vm294_vm1, %v264_v14  ;;  %2300 = vmatprep.mubr.msk.bf16.mxu0 %vm294_vm1, %v2885_v15 }
  0x49   : > { %2282 = vmatprep.mubr.msk.bf16.mxu1 %vm294_vm1, %v265_v16 }
  0x4f   : > { %2301 = vmatmul.mubr.msk.bf16.gmra.mxu0 %vm294_vm1, %v2897_v22 }
  0x50   : > { %2283 = vmatmul.mubr.msk.bf16.gmra.mxu1 %vm294_vm1, %v266_v25  ;;  %2324 = vmatprep.mubr.msk.bf16.mxu0 %vm294_vm1, %v2767_v13  ;;  %v2138_v13 = vld [vmem:[%s3305_s1 + $0x20] sm:$0xf] }
  0x51   : > { %2306 = vmatprep.mubr.msk.bf16.mxu1 %vm294_vm1, %v260_v48  ;;  %v1597_v37 = vsel %vm319_vm0, %v2138_v13, 0 }
  0x57   : > { %2325 = vmatmul.mubr.msk.bf16.vlgmr.msra.gmra.mxu0 %vm294_vm1, %v2784_v23 }
  0x58   : > { %2307 = vmatmul.mubr.msk.bf16.vlgmr.msra.gmra.mxu1 %vm294_vm1, %v2831_v50  ;;  %2359 = vmatpush3.bf16.msra.mxu0 %v1265_v26 }
  0x59   : > { %2341 = vmatpush3.bf16.msra.mxu1 %v1096_v27  ;;  %2310 = vmatprep.mubr.msk.bf16.mxu1 %vm294_vm1, %v2861_v0 }
  0x5a   : > { %2328 = vmatprep.mubr.msk.bf16.mxu0 %vm294_vm1, %v2809_v35  ;;  %2457 = vmatprep.subr.msk.bf16.mxu1 %vm319_vm0, %v2113_v28 }
  0x5b   : > { %2458 = vmatprep.subr.msk.bf16.mxu0 %vm319_vm0, %v2138_v13 }
  0x5f   : > { %2329 = vmatmul.mubr.msk.bf16.gmra.mxu0 %vm294_vm1, %v2765_v12 }
  0x60   : > { %2311 = vmatmul.mubr.msk.bf16.gmra.mxu1 %vm294_vm1, %v2865_v2  ;;  %2332 = vmatprep.mubr.msk.bf16.mxu0 %vm294_vm1, %v2774_v18 }
  0x61   : > { %2314 = vmatprep.mubr.msk.bf16.mxu1 %vm294_vm1, %v264_v14 }
  0x67   : > { %2333 = vmatmul.mubr.msk.bf16.gmra.mxu0 %vm294_vm1, %v2786_v24 }
  0x68   : > { %2315 = vmatmul.mubr.msk.bf16.gmra.mxu1 %vm294_vm1, %v265_v16  ;;  %2336 = vmatprep.mubr.msk.bf16.mxu0 %vm294_vm1, %v2812_v36 }
  0x69   : > { %2318 = vmatprep.mubr.msk.bf16.mxu1 %vm294_vm1, %v266_v25 }
  0x6f   : > { %2337 = vmatmul.mubr.msk.bf16.gmra.mxu0 %vm294_vm1, %v902_v33 }
  0x70   : > { %2319 = vmatmul.mubr.msk.bf16.gmra.mxu1 %vm294_vm1, %v736_v34  ;;  %2360 = vmatprep.mubr.msk.bf16.mxu0 %vm294_vm1, %v2831_v50 }
  0x71   : > { %2342 = vmatprep.mubr.msk.bf16.mxu1 %vm294_vm1, %v2826_v45 }
  0x77   : > { %2361 = vmatmul.mubr.msk.bf16.vlgmr.msra.gmra.mxu0 %vm294_vm1, %v2861_v0 }
  0x78   : > { %2343 = vmatmul.mubr.msk.bf16.vlgmr.msra.gmra.mxu1 %vm294_vm1, %v2834_v52  ;;  %2395 = vmatpush3.bf16.msra.mxu0 %v1597_v37 }
  0x79   : > { %2377 = vmatpush3.bf16.msra.mxu1 %v1431_v38  ;;  %2346 = vmatprep.mubr.msk.bf16.mxu1 %vm294_vm1, %v2858_v63 }
  0x7a   : > { %2364 = vmatprep.mubr.msk.bf16.mxu0 %vm294_vm1, %v2865_v2 }
  0x7f   : > { %2365 = vmatmul.mubr.msk.bf16.gmra.mxu0 %vm294_vm1, %v264_v14 }
  0x80   : > { %2347 = vmatmul.mubr.msk.bf16.gmra.mxu1 %vm294_vm1, %v2863_v1  ;;  %2368 = vmatprep.mubr.msk.bf16.mxu0 %vm294_vm1, %v265_v16 }
  0x81   : > { %2350 = vmatprep.mubr.msk.bf16.mxu1 %vm294_vm1, %v2883_v11 }
  0x87   : > { %2369 = vmatmul.mubr.msk.bf16.gmra.mxu0 %vm294_vm1, %v266_v25 }
  0x88   : > { %2351 = vmatmul.mubr.msk.bf16.gmra.mxu1 %vm294_vm1, %v2885_v15  ;;  %2372 = vmatprep.mubr.msk.bf16.mxu0 %vm294_vm1, %v736_v34 }
  0x89   : > { %2354 = vmatprep.mubr.msk.bf16.mxu1 %vm294_vm1, %v2897_v22 }
  0x8f   : > { %2373 = vmatmul.mubr.msk.bf16.gmra.mxu0 %vm294_vm1, %v1237_v43 }
  0x90   : > { %2355 = vmatmul.mubr.msk.bf16.gmra.mxu1 %vm294_vm1, %v1068_v44  ;;  %2396 = vmatprep.mubr.msk.bf16.mxu0 %vm294_vm1, %v2834_v52 }
  0x91   : > { %2378 = vmatprep.mubr.msk.bf16.mxu1 %vm294_vm1, %v2784_v23  ;;  %v2137_v23 = vld [vmem:[%s2755_s13 + $0xe2] sm:$0xff] }
  0x97   : > { %2397 = vmatmul.mubr.msk.bf16.vlgmr.msra.gmra.mxu0 %vm294_vm1, %v2858_v63 }
  0x98   : > { %2379 = vmatmul.mubr.msk.bf16.vlgmr.msra.gmra.mxu1 %vm294_vm1, %v2809_v35  ;;  %2400 = vmatprep.mubr.msk.bf16.mxu0 %vm294_vm1, %v2863_v1  ;;  %v2111_v35 = vld [vmem:[%s2755_s13 + $0xd9] sm:$0xff] }
  0x99   : > { %2382 = vmatprep.mubr.msk.bf16.mxu1 %vm294_vm1, %v2765_v12  ;;  %v2136_v12 = vld [vmem:[%s2755_s13 + $0xda] sm:$0xff] }
  0x9a   : > { %v1569_v45 = vpack.c.bf16 %v2137_v23, %v2136_v12 }
  0x9f   : > { %2401 = vmatmul.mubr.msk.bf16.gmra.mxu0 %vm294_vm1, %v2883_v11 }
  0xa0   : > { %2383 = vmatmul.mubr.msk.bf16.gmra.mxu1 %vm294_vm1, %v2774_v18  ;;  %2404 = vmatprep.mubr.msk.bf16.mxu0 %vm294_vm1, %v2885_v15  ;;  %v2112_v18 = vld [vmem:[%s2755_s13 + $0xe1] sm:$0xff] }
  0xa1   : > { %2386 = vmatprep.mubr.msk.bf16.mxu1 %vm294_vm1, %v2786_v24  ;;  %v1403_v46 = vpack.c.bf16 %v2112_v18, %v2111_v35 }
  0xa7   : > { %2405 = vmatmul.mubr.msk.bf16.gmra.mxu0 %vm294_vm1, %v2897_v22 }
  0xa8   : > { %2387 = vmatmul.mubr.msk.bf16.gmra.mxu1 %vm294_vm1, %v2812_v36  ;;  %2408 = vmatprep.mubr.msk.bf16.mxu0 %vm294_vm1, %v1068_v44 }
  0xa9   : > { %2390 = vmatprep.mubr.msk.bf16.mxu1 %vm294_vm1, %v902_v33 }
  0xaf   : > { %2409 = vmatmul.mubr.msk.bf16.gmra.mxu0 %vm294_vm1, %v1569_v45 }
  0xb0   : > { %2391 = vmatmul.mubr.msk.bf16.gmra.mxu1 %vm294_vm1, %v1403_v46 }
  0xe7   : > { %v2254_v24 = vpop.f32.mrf.mxu0 }
  0xe8   : > { %v2262_v47 = vpop.f32.mrf.mxu1 }
  0xe9   : > { %v357_v48 = vpop.f32.mrf.mxu0 }
  0xea   : > { %v389_v49 = vpop.f32.mrf.mxu1 }
  0xeb   : > { %v2255_v50 = vpop.f32.mrf.mxu0 }
  0xec   : > { %v2263_v36 = vpop.f32.mrf.mxu1 }
  0xed   : > { %v360_v51 = vpop.f32.mrf.mxu0 }
  0xee   : > { %v392_v52 = vpop.f32.mrf.mxu1 }
  0xef   : > { %v2258_v53 = vpop.f32.mrf.mxu0 }
  0xf0   : > { %v2266_v54 = vpop.f32.mrf.mxu1 }
  0xf1   : > { %v373_v55 = vpop.f32.mrf.mxu0 }
  0xf2   : > { %v405_v56 = vpop.f32.mrf.mxu1 }
  0xf3   : > { %v2259_v57 = vpop.f32.mrf.mxu0 }
  0xf4   : > { %v2267_v58 = vpop.f32.mrf.mxu1 }
  0xf5   : > { %v376_v59 = vpop.f32.mrf.mxu0 }
  0xf6   : > { %v3006_v60 = vpop.f32.mrf.mxu1 }
  0xf7   : > { %v2290_v61 = vpop.f32.mrf.mxu0 }
  0xf8   : > { %v2272_v62 = vpop.f32.mrf.mxu1 }
  0xf9   : > { %v490_v63 = vadd.f32 %v2272_v62, %v2254_v24  ;;  %v631_v0 = vpop.f32.mrf.mxu0 }
  0xfa   : > { %v481_v1 = vpop.f32.mrf.mxu1 }
  0xfb   : > { %v696_v2 = vadd.f32 %v2290_v61, %v490_v63  ;;  %v482_v3 = vadd.f32 %v481_v1, %v357_v48  ;;  %v2291_v4 = vpop.f32.mrf.mxu0 }
  0xfc   : > { %v2273_v5 = vpop.f32.mrf.mxu1 }
  0xfd   : > { %v3008_v6 = vadd.f32 %v631_v0, %v482_v3  ;;  %v493_v7 = vadd.f32 %v2273_v5, %v2255_v50  ;;  %v634_v8 = vpop.f32.mrf.mxu0 }
  0xfe   : > { %v484_v9 = vpop.f32.mrf.mxu1 }
  0xff   : > { %v3010_v10 = vadd.f32 %v2291_v4, %v493_v7  ;;  %v485_v11 = vadd.f32 %v484_v9, %v360_v51  ;;  %v2294_v14 = vpop.f32.mrf.mxu0 }
 0x100   : > { %v2276_v15 = vpop.f32.mrf.mxu1 }
 0x101   : > { %v3012_v16 = vadd.f32 %v634_v8, %v485_v11  ;;  %v506_v17 = vadd.f32 %v2276_v15, %v2258_v53  ;;  %v647_v19 = vpop.f32.mrf.mxu0 }
 0x102   : > { %v497_v20 = vpop.f32.mrf.mxu1 }
 0x103   : > { %v700_v21 = vadd.f32 %v2294_v14, %v506_v17  ;;  %v498_v22 = vadd.f32 %v497_v20, %v373_v55  ;;  %v2295_v25 = vpop.f32.mrf.mxu0 }
 0x104   : > { %v2277_v26 = vpop.f32.mrf.mxu1 }
 0x105   : > { %v3014_v27 = vadd.f32 %v647_v19, %v498_v22  ;;  %v509_v28 = vadd.f32 %v2277_v26, %v2259_v57  ;;  %v650_v13 = vpop.f32.mrf.mxu0 }
 0x106   : > { %v500_v29 = vpop.f32.mrf.mxu1 }
 0x107   : > { %v3016_v30 = vadd.f32 %v2295_v25, %v509_v28  ;;  %v501_v31 = vadd.f32 %v500_v29, %v376_v59  ;;  %v2298_v32 = vpop.f32.mrf.mxu0 }
 0x108   : > { %v2280_v33 = vpop.f32.mrf.mxu1 }
 0x109   : > { %v3018_v34 = vadd.f32 %v650_v13, %v501_v31  ;;  %v522_v37 = vadd.f32 %v2280_v33, %v2262_v47  ;;  %v663_v38 = vpop.f32.mrf.mxu0 }
 0x10a   : > { %v513_v39 = vpop.f32.mrf.mxu1 }
 0x10b   : > { %v704_v40 = vadd.f32 %v2298_v32, %v522_v37  ;;  %v514_v41 = vadd.f32 %v513_v39, %v389_v49  ;;  %v2299_v42 = vpop.f32.mrf.mxu0 }
 0x10c   : > { %v2281_v43 = vpop.f32.mrf.mxu1 }
 0x10d   : > { %v3020_v44 = vadd.f32 %v663_v38, %v514_v41  ;;  %v525_v12 = vadd.f32 %v2281_v43, %v2263_v36  ;;  %v666_v23 = vpop.f32.mrf.mxu0 }
 0x10e   : > { %v516_v35 = vpop.f32.mrf.mxu1 }
 0x10f   : > { %v3022_v18 = vadd.f32 %v2299_v42, %v525_v12  ;;  %v517_v45 = vadd.f32 %v516_v35, %v392_v52  ;;  %v2302_v46 = vpop.f32.mrf.mxu0 }
 0x110   : > { %v2284_v24 = vpop.f32.mrf.mxu1 }
 0x111   : > { %v3024_v48 = vadd.f32 %v666_v23, %v517_v45  ;;  %v538_v50 = vadd.f32 %v2284_v24, %v2266_v54  ;;  %v679_v47 = vpop.f32.mrf.mxu0 }
 0x112   : > { %v529_v51 = vpop.f32.mrf.mxu1 }
 0x113   : > { %v708_v53 = vadd.f32 %v2302_v46, %v538_v50  ;;  %v530_v55 = vadd.f32 %v529_v51, %v405_v56  ;;  %v2303_v49 = vpop.f32.mrf.mxu0 }
 0x114   : > { %v2285_v57 = vpop.f32.mrf.mxu1 }
 0x115   : > { %v3026_v59 = vadd.f32 %v679_v47, %v530_v55  ;;  %v541_v61 = vadd.f32 %v2285_v57, %v2267_v58  ;;  %v682_v36 = vpop.f32.mrf.mxu0 }
 0x116   : > { %v532_v62 = vpop.f32.mrf.mxu1 }
 0x117   : > { %v3028_v63 = vadd.f32 %v2303_v49, %v541_v61  ;;  %v533_v52 = vadd.f32 %v532_v62, %v3006_v60  ;;  %v2326_v0 = vpop.f32.mrf.mxu0 }
 0x118   : > { %v2308_v1 = vpop.f32.mrf.mxu1 }
 0x119   : > { %v3031_v3 = vadd.f32 %v682_v36, %v533_v52  ;;  %v865_v54 = vadd.f32 %v2308_v1, %v696_v2  ;;  %v3033_v4 = vpop.f32.mrf.mxu0 }
 0x11a   : > { %v800_v5 = vpop.f32.mrf.mxu1 }
 0x11b   : > { %3312 = vst [vmem:[#allocation6_spill] sm:$0xff] %v3031_v3  ;;  %v3035_v56 = vadd.f32 %v2326_v0, %v865_v54  ;;  %v3037_v7 = vpop.f32.mrf.mxu0 }
 0x11c   : > { %v2309_v8 = vpop.f32.mrf.mxu1 }
 0x11d   : > { %v3039_v58 = vpop.f32.mrf.mxu0  ;;  %v866_v3 = vadd.f32 %v2309_v8, %v3010_v10 }
 0x11e   : > { %v803_v9 = vpop.f32.mrf.mxu1 }
 0x11f   : > { %v2330_v11 = vpop.f32.mrf.mxu0 }
 0x120   : > { %v2312_v14 = vpop.f32.mrf.mxu1 }
 0x121   : > { %v869_v15 = vadd.f32 %v2312_v14, %v700_v21  ;;  %v3041_v60 = vpop.f32.mrf.mxu0 }
 0x122   : > { %v3043_v17 = vpop.f32.mrf.mxu1 }
 0x123   : > { %v3045_v19 = vadd.f32 %v2330_v11, %v869_v15  ;;  %v3047_v2 = vpop.f32.mrf.mxu0 }
 0x124   : > { %v3049_v20 = vpop.f32.mrf.mxu1 }
 0x125   : > { %v3051_v22 = vpop.f32.mrf.mxu0 }
 0x126   : > { %v3053_v25 = vpop.f32.mrf.mxu1 }
 0x127   : > { %v2334_v26 = vpop.f32.mrf.mxu0 }
 0x128   : > { %v2316_v28 = vpop.f32.mrf.mxu1 }
 0x129   : > { %v873_v13 = vadd.f32 %v2316_v28, %v704_v40  ;;  %v3055_v29 = vpop.f32.mrf.mxu0 }
 0x12a   : > { %v3057_v21 = vpop.f32.mrf.mxu1 }
 0x12b   : > { %v3059_v31 = vadd.f32 %v2334_v26, %v873_v13  ;;  %v3061_v32 = vpop.f32.mrf.mxu0 }
 0x12c   : > { %v3063_v33 = vpop.f32.mrf.mxu1 }
 0x12d   : > { %v3065_v37 = vpop.f32.mrf.mxu0 }
 0x12e   : > { %v3067_v38 = vpop.f32.mrf.mxu1 }
 0x12f   : > { %v2338_v39 = vpop.f32.mrf.mxu0 }
 0x130   : > { %v2320_v41 = vpop.f32.mrf.mxu1 }
 0x131   : > { %v877_v42 = vadd.f32 %v2320_v41, %v708_v53  ;;  %v3069_v43 = vpop.f32.mrf.mxu0 }
 0x132   : > { %v3071_v40 = vpop.f32.mrf.mxu1 }
 0x133   : > { %v3073_v12 = vadd.f32 %v2338_v39, %v877_v42  ;;  %v3075_v23 = vpop.f32.mrf.mxu0 }
 0x134   : > { %3314 = vst [vmem:[#allocation8_spill] sm:$0xff] %v3075_v23  ;;  %v3077_v35 = vpop.f32.mrf.mxu1 }
 0x135   : > { %3313 = vst [vmem:[#allocation7_spill] sm:$0xff] %v3073_v12  ;;  %v3079_v45 = vpop.f32.mrf.mxu0 }
 0x136   : > { %3315 = vst [vmem:[#allocation9_spill] sm:$0xff] %v3079_v45  ;;  %v3081_v46 = vpop.f32.mrf.mxu1  ;;  %v863_v45 = vadd.f32 %v800_v5, %v3008_v6  ;;  %v1032_v6 = vadd.f32 %v3037_v7, %v866_v3  ;;  %v870_v3 = vadd.f32 %v3049_v20, %v3016_v30  ;;  %v871_v30 = vadd.f32 %v3057_v21, %v3020_v44 }
 0x137   : > { %3316 = vst [vmem:[#allocation10_spill] sm:$0xff] %v3081_v46  ;;  %v2362_v24 = vpop.f32.mrf.mxu0 }
 0x138   : > { %v2344_v50 = vpop.f32.mrf.mxu1 }
 0x139   : > { %v1301_v47 = vpop.f32.mrf.mxu0  ;;  %v1197_v5 = vadd.f32 %v2344_v50, %v3035_v56 }
 0x13a   : > { %v1132_v51 = vpop.f32.mrf.mxu1 }
 0x13b   : > { %v2363_v55 = vpop.f32.mrf.mxu0 }
 0x13c   : > { %v2345_v53 = vpop.f32.mrf.mxu1 }
 0x13d   : > { %v1304_v49 = vpop.f32.mrf.mxu0 }
 0x13e   : > { %v1135_v57 = vpop.f32.mrf.mxu1 }
 0x13f   : > { %v3083_v61 = vpop.f32.mrf.mxu0 }
 0x140   : > { %v2348_v36 = vpop.f32.mrf.mxu1 }
 0x141   : > { %v3085_v62 = vpop.f32.mrf.mxu0  ;;  %v1201_v20 = vadd.f32 %v2348_v36, %v3045_v19  ;;  %v1037_v36 = vadd.f32 %v3055_v29, %v871_v30 }
 0x142   : > { %v1148_v52 = vpop.f32.mrf.mxu1 }
 0x143   : > { %v3087_v0 = vpop.f32.mrf.mxu0 }
 0x144   : > { %v2349_v1 = vpop.f32.mrf.mxu1 }
 0x145   : > { %v3089_v54 = vpop.f32.mrf.mxu0 }
 0x146   : > { %v3091_v11 = vpop.f32.mrf.mxu1 }
 0x147   : > { %v3093_v14 = vpop.f32.mrf.mxu0 }
 0x148   : > { %3317 = vst [vmem:[#allocation11_spill] sm:$0xff] %v3093_v14  ;;  %v3095_v15 = vpop.f32.mrf.mxu1 }
 0x149   : > { %v3097_v26 = vpop.f32.mrf.mxu0 }
 0x14a   : > { %3318 = vst [vmem:[#allocation12_spill] sm:$0xff] %v3097_v26  ;;  %v3099_v28 = vpop.f32.mrf.mxu1  ;;  %v864_v26 = vadd.f32 %v803_v9, %v3012_v16 }
 0x14b   : > { %v3101_v13 = vpop.f32.mrf.mxu0 }
 0x14c   : > { %3319 = vst [vmem:[#allocation13_spill] sm:$0xff] %v3101_v13  ;;  %v3103_v39 = vpop.f32.mrf.mxu1  ;;  %v1029_v13 = vadd.f32 %v3033_v4, %v863_v45  ;;  %v1030_v8 = vadd.f32 %v3039_v58, %v864_v26  ;;  %v867_v4 = vadd.f32 %v3043_v17, %v3014_v27  ;;  %v1198_v45 = vadd.f32 %v2345_v53, %v1032_v6 }
 0x14d   : > { %3320 = vst [vmem:[#allocation14_spill] sm:$0xff] %v3103_v39  ;;  %v3105_v41 = vpop.f32.mrf.mxu0  ;;  %v868_v27 = vadd.f32 %v3053_v25, %v3018_v34  ;;  %v872_v6 = vadd.f32 %v3067_v38, %v3024_v48 }
 0x14e   : > { %3321 = vst [vmem:[#allocation15_spill] sm:$0xff] %v3105_v41  ;;  %v3107_v42 = vpop.f32.mrf.mxu1  ;;  %v1033_v7 = vadd.f32 %v3041_v60, %v867_v4  ;;  %v1367_v50 = vadd.f32 %v2363_v55, %v1198_v45  ;;  %v874_v60 = vadd.f32 %v3063_v33, %v3022_v18  ;;  %v875_v45 = vadd.f32 %v3071_v40, %v3026_v59 }
 0x14f   : > { %v3110_v12 = vpop.f32.mrf.mxu0  ;;  %v1034_v25 = vadd.f32 %v3051_v22, %v868_v27  ;;  %v1370_v22 = vadd.f32 %v3083_v61, %v1201_v20  ;;  %v1205_v59 = vadd.f32 %v3095_v15, %v3059_v31  ;;  %v3331_v30 = vld [vmem:[#allocation11_spill] sm:$0xff] }
 0x150   : > { %3322 = vst [vmem:[#allocation16_spill] sm:$0xff] %v3110_v12  ;;  %v3112_v46 = vpop.f32.mrf.mxu1  ;;  %v1195_v12 = vadd.f32 %v1132_v51, %v1029_v13  ;;  %v1199_v26 = vadd.f32 %v1148_v52, %v1033_v7  ;;  %v1040_v52 = vadd.f32 %v3061_v32, %v874_v60  ;;  %v1203_v32 = vadd.f32 %v3099_v28, %v1037_v36 }
 0x151   : > { %3323 = vst [vmem:[#allocation17_spill] sm:$0xff] %v3112_v46  ;;  %v3115_v14 = vpop.f32.mrf.mxu0  ;;  %v1038_v28 = vadd.f32 %v3065_v37, %v872_v6  ;;  %v1041_v27 = vadd.f32 %v3069_v43, %v875_v45  ;;  %v3330_v37 = vld [vmem:[#allocation8_spill] sm:$0xff]  ;;  %v1374_v60 = vadd.f32 %v3331_v30, %v1205_v59  ;;  %v3332_v43 = vld [vmem:[#allocation6_spill] sm:$0xff] }
 0x152   : > { %3324 = vst [vmem:[#allocation18_spill] sm:$0xff] %v3115_v14  ;;  %v3117_v23 = vpop.f32.mrf.mxu1  ;;  %v1364_v14 = vadd.f32 %v1301_v47, %v1195_v12  ;;  %v1368_v44 = vadd.f32 %v3085_v62, %v1199_v26 }
 0x153   : > { %3325 = vst [vmem:[#allocation19_spill] sm:$0xff] %v3117_v23  ;;  %v3121_v39 = vpop.f32.mrf.mxu0  ;;  %v1204_v31 = vadd.f32 %v3107_v42, %v1038_v28 }
 0x154   : > { %3326 = vst [vmem:[#allocation20_spill] sm:$0xff] %v3121_v39  ;;  %v3123_v41 = vpop.f32.mrf.mxu1  ;;  %v1366_v39 = vadd.f32 %v2362_v24, %v1197_v5 }
 0x155   : > { %3327 = vst [vmem:[#allocation21_spill] sm:$0xff] %v3123_v41  ;;  %v3127_v46 = vpop.f32.mrf.mxu0  ;;  %v1196_v41 = vadd.f32 %v1135_v57, %v1030_v8  ;;  %v1036_v57 = vadd.f32 %v3047_v2, %v870_v3 }
 0x156   : > { %v3129_v10 = vpop.f32.mrf.mxu1 }
 0x157   : > { %v2398_v16 = vpop.f32.mrf.mxu0  ;;  %v1365_v53 = vadd.f32 %v1304_v49, %v1196_v41  ;;  %v1202_v49 = vadd.f32 %v2349_v1, %v1036_v57  ;;  %v1200_v1 = vadd.f32 %v3091_v11, %v1034_v25 }
 0x158   : > { %v2380_v9 = vpop.f32.mrf.mxu1 }
 0x159   : > { %v1633_v23 = vpop.f32.mrf.mxu0  ;;  %v1532_v51 = vadd.f32 %v2380_v9, %v1366_v39  ;;  %v1371_v29 = vadd.f32 %v3087_v0, %v1202_v49  ;;  %v1369_v7 = vadd.f32 %v3089_v54, %v1200_v1  ;;  %v3329_v54 = vld [vmem:[#allocation12_spill] sm:$0xff] }
 0x15a   : > { %v1467_v56 = vpop.f32.mrf.mxu1  ;;  %v3336_v1 = vld [vmem:[#allocation19_spill] sm:$0xff] }
 0x15b   : > { %v1530_v13 = vadd.f32 %v1467_v56, %v1364_v14  ;;  %v2399_v58 = vpop.f32.mrf.mxu0  ;;  %v1698_v14 = vadd.f32 %v2398_v16, %v1532_v51  ;;  %v878_v56 = vadd.f32 %v3077_v35, %v3028_v63 }
 0x15c   : > { %v2381_v17 = vpop.f32.mrf.mxu1 }
 0x15d   : > { %v1696_v24 = vadd.f32 %v1633_v23, %v1530_v13  ;;  %v1533_v12 = vadd.f32 %v2381_v17, %v1367_v50  ;;  %v1636_v47 = vpop.f32.mrf.mxu0  ;;  %v3149_v23 = vld [vmem:[%s3306_s2] ss:$0 sm:$0xff]  ;;  %v3328_v17 = vld [vmem:[#allocation14_spill] sm:$0xff]  ;;  %v1044_v57 = vadd.f32 %v3330_v37, %v878_v56 }
 0x15e   : > { %v1470_v55 = vpop.f32.mrf.mxu1  ;;  %v1721_v5 = vadd.f32 %v3149_v23, %v1698_v14 }
 0x15f   : > { %v1531_v39 = vadd.f32 %v1470_v55, %v1365_v53  ;;  %v2402_v34 = vpop.f32.mrf.mxu0  ;;  %v1719_v21 = vadd.f32 %v3149_v23, %v1696_v24  ;;  %v1699_v18 = vadd.f32 %v2399_v58, %v1533_v12  ;;  %v1206_v53 = vadd.f32 %v3328_v17, %v1040_v52  ;;  %v3335_v52 = vld [vmem:[#allocation15_spill] sm:$0xff] }
 0x160   : > { %v2384_v2 = vpop.f32.mrf.mxu1  ;;  %v1737_v50 = vmax.f32 %v1721_v5, 0.0  ;;  %v1372_v24 = vadd.f32 %v3329_v54, %v1203_v32 }
 0x161   : > { %v1697_v33 = vadd.f32 %v1636_v47, %v1531_v39  ;;  %v1649_v19 = vpop.f32.mrf.mxu0  ;;  %v1536_v61 = vadd.f32 %v2384_v2, %v1370_v22  ;;  %v1735_v11 = vmax.f32 %v1719_v21, 0.0  ;;  %v1722_v9 = vadd.f32 %v3149_v23, %v1699_v18  ;;  %v3333_v39 = vld [vmem:[#allocation10_spill] sm:$0xff]  ;;  %v3334_v21 = vld [vmem:[#allocation13_spill] sm:$0xff] }
 0x162   : > { %v1483_v41 = vpop.f32.mrf.mxu1  ;;  %v876_v25 = vadd.f32 %v3333_v39, %v3332_v43  ;;  %v1375_v18 = vadd.f32 %v3334_v21, %v1206_v53  ;;  %v1373_v22 = vadd.f32 %v3335_v52, %v1204_v31  ;;  %v3342_v53 = vld [vmem:[#allocation16_spill] sm:$0xff] }
 0x163   : > { %v1720_v62 = vadd.f32 %v3149_v23, %v1697_v33  ;;  %v1534_v8 = vadd.f32 %v1483_v41, %v1368_v44  ;;  %v2403_v4 = vpop.f32.mrf.mxu0  ;;  %v1702_v26 = vadd.f32 %v2402_v34, %v1536_v61  ;;  %v1738_v15 = vmax.f32 %v1722_v9, 0.0  ;;  %v3343_v31 = vld [vmem:[#allocation20_spill] sm:$0xff] }
 0x164   : > { %v2385_v16 = vpop.f32.mrf.mxu1  ;;  %v1207_v41 = vadd.f32 %v3336_v1, %v1041_v27 }
 0x165   : > { %v1736_v3 = vmax.f32 %v1720_v62, 0.0  ;;  %v1700_v48 = vadd.f32 %v1649_v19, %v1534_v8  ;;  %v1652_v38 = vpop.f32.mrf.mxu0  ;;  %v1537_v40 = vadd.f32 %v2385_v16, %v1371_v29  ;;  %v1725_v42 = vadd.f32 %v3149_v23, %v1702_v26  ;;  %v3337_v8 = vld [vmem:[#allocation7_spill] sm:$0xff] }
 0x166   : > { %v1486_v0 = vpop.f32.mrf.mxu1 }
 0x167   : > { %v1752_v51 = vadd.f32 %v1736_v3, %v1735_v11  ;;  %v1723_v13 = vadd.f32 %v3149_v23, %v1700_v48  ;;  %v2406_v58 = vpop.f32.mrf.mxu0  ;;  %v1535_v63 = vadd.f32 %v1486_v0, %v1369_v7  ;;  %v1703_v20 = vadd.f32 %v2403_v4, %v1537_v40  ;;  %v3338_v4 = vld [vmem:[#allocation17_spill] sm:$0xff] }
 0x168   : > { %v2388_v35 = vpop.f32.mrf.mxu1  ;;  %v1209_v45 = vadd.f32 %v3338_v4, %v3337_v8  ;;  %v3339_v11 = vld [vmem:[#allocation9_spill] sm:$0xff]  ;;  %v1741_v7 = vmax.f32 %v1725_v42, 0.0 }
 0x169   : > { %v1753_v12 = vadd.f32 %v1752_v51, %v1737_v50  ;;  %v1665_v47 = vpop.f32.mrf.mxu0  ;;  %v1701_v55 = vadd.f32 %v1652_v38, %v1535_v63  ;;  %v1739_v34 = vmax.f32 %v1723_v13, 0.0  ;;  %v1540_v19 = vadd.f32 %v2388_v35, %v1374_v60  ;;  %v3340_v3 = vld [vmem:[#allocation21_spill] sm:$0xff]  ;;  %v3341_v50 = vld [vmem:[#allocation18_spill] sm:$0xff] }
 0x16a   : > { %v1499_v14 = vpop.f32.mrf.mxu1  ;;  %v1726_v29 = vadd.f32 %v3149_v23, %v1703_v20  ;;  %v1042_v9 = vadd.f32 %v3339_v11, %v876_v25  ;;  %v1210_v48 = vadd.f32 %v3340_v3, %v1044_v57  ;;  %v1376_v51 = vadd.f32 %v3341_v50, %v1207_v41 }
 0x16b   : > { %v1754_v49 = vadd.f32 %v1753_v12, %v1738_v15  ;;  %v1538_v2 = vadd.f32 %v1499_v14, %v1372_v24  ;;  %v2407_v44 = vpop.f32.mrf.mxu0  ;;  %v1724_v33 = vadd.f32 %v3149_v23, %v1701_v55  ;;  %v1706_v40 = vadd.f32 %v2406_v58, %v1540_v19 }
 0x16c   : > { %v2389_v36 = vpop.f32.mrf.mxu1  ;;  %v1208_v13 = vadd.f32 %v3129_v10, %v1042_v9  ;;  %v1378_v26 = vadd.f32 %v3342_v53, %v1209_v45  ;;  %v1742_v63 = vmax.f32 %v1726_v29, 0.0  ;;  %v1379_v15 = vadd.f32 %v3343_v31, %v1210_v48  ;;  %v1751_v48 = vld [vmem:[#allocation2] sm:$0x1] }
 0x16d   : > { %v1755_v6 = vadd.f32 %v1754_v49, %v1739_v34  ;;  %v1704_v5 = vadd.f32 %v1665_v47, %v1538_v2  ;;  %v1668_v62 = vpop.f32.mrf.mxu0  ;;  %v1740_v32 = vmax.f32 %v1724_v33, 0.0  ;;  %v1541_v61 = vadd.f32 %v2389_v36, %v1375_v18 }
 0x16e   : > { %v1502_v16 = vpop.f32.mrf.mxu1  ;;  %v1729_v47 = vadd.f32 %v3149_v23, %v1706_v40  ;;  %v1377_v20 = vadd.f32 %v3127_v46, %v1208_v13 }
 0x16f   : > { %v1539_v38 = vadd.f32 %v1502_v16, %v1373_v22  ;;  %v2410_v56 = vpop.f32.mrf.mxu0  ;;  %v1756_v59 = vadd.f32 %v1755_v6, %v1740_v32  ;;  %v1727_v0 = vadd.f32 %v3149_v23, %v1704_v5  ;;  %v1707_v54 = vadd.f32 %v2407_v44, %v1541_v61 }
 0x170   : > { %v2392_v28 = vpop.f32.mrf.mxu1  ;;  %v1745_v2 = vmax.f32 %v1729_v47, 0.0 }
 0x171   : > { %v1705_v27 = vadd.f32 %v1668_v62, %v1539_v38  ;;  %v1681_v17 = vpop.f32.mrf.mxu0  ;;  %v1757_v35 = vadd.f32 %v1756_v59, %v1741_v7  ;;  %v1743_v37 = vmax.f32 %v1727_v0, 0.0  ;;  %v1544_v30 = vadd.f32 %v2392_v28, %v1378_v26 }
 0x172   : > { %v1515_v24 = vpop.f32.mrf.mxu1  ;;  %v1730_v39 = vadd.f32 %v3149_v23, %v1707_v54 }
 0x173   : > { %v1728_v12 = vadd.f32 %v3149_v23, %v1705_v27  ;;  %v1542_v58 = vadd.f32 %v1515_v24, %v1376_v51  ;;  %v1758_v57 = vadd.f32 %v1757_v35, %v1742_v63  ;;  %v2411_v10 = vpop.f32.mrf.mxu0  ;;  %v1710_v21 = vadd.f32 %v2410_v56, %v1544_v30 }
 0x174   : > { %v2393_v60 = vpop.f32.mrf.mxu1  ;;  %v1746_v19 = vmax.f32 %v1730_v39, 0.0 }
 0x175   : > { %v1744_v55 = vmax.f32 %v1728_v12, 0.0  ;;  %v1708_v14 = vadd.f32 %v1681_v17, %v1542_v58  ;;  %v1759_v43 = vadd.f32 %v1758_v57, %v1743_v37  ;;  %v1545_v25 = vadd.f32 %v2393_v60, %v1379_v15  ;;  %v1684_v42 = vpop.f32.mrf.mxu0 }
 0x176   : > { %v1518_v34 = vpop.f32.mrf.mxu1  ;;  %v1733_v22 = vadd.f32 %v3149_v23, %v1710_v21 }
 0x177   : > { %v1543_v49 = vadd.f32 %v1518_v34, %v1377_v20  ;;  %v1760_v44 = vadd.f32 %v1759_v43, %v1744_v55  ;;  %v1731_v18 = vadd.f32 %v3149_v23, %v1708_v14  ;;  %v1711_v52 = vadd.f32 %v2411_v10, %v1545_v25 }
 0x178   : > { %v1749_v8 = vmax.f32 %v1733_v22, 0.0 }
 0x179   : > { %v1709_v33 = vadd.f32 %v1684_v42, %v1543_v49  ;;  %v1761_v36 = vadd.f32 %v1760_v44, %v1745_v2  ;;  %v1747_v1 = vmax.f32 %v1731_v18, 0.0  ;;  %v1734_v62 = vadd.f32 %v3149_v23, %v1711_v52 }
 0x17b   : > { %v1732_v46 = vadd.f32 %v3149_v23, %v1709_v33  ;;  %v1762_v41 = vadd.f32 %v1761_v36, %v1746_v19  ;;  %v1750_v45 = vmax.f32 %v1734_v62, 0.0 }
 0x17d   : > { %v1748_v6 = vmax.f32 %v1732_v46, 0.0  ;;  %v1763_v5 = vadd.f32 %v1762_v41, %v1747_v1 }
 0x17f   : > { %v1764_v4 = vadd.f32 %v1763_v5, %v1748_v6 }
 0x181   : > { %v1765_v29 = vadd.f32 %v1764_v4, %v1749_v8 }
 0x183   : > { %v1766_v32 = vadd.f32 %v1765_v29, %v1750_v45 }
 0x185   : > { %v1767_v61 = vrot.slane %v1766_v32, 4 }
 0x187   : > { %v1768_v16 = vadd.f32 %v1767_v61, %v1766_v32 }
 0x189   : > { %v1769_v11 = vrot.slane %v1768_v16, 2 }
 0x18b   : > { %v1770_v9 = vadd.f32 %v1769_v11, %v1768_v16 }
 0x18d   : > { %v1771_v3 = vrot.slane %v1770_v9, 1 }
 0x18f   : > { %v1772_v38 = vadd.f32 %v1771_v3, %v1770_v9  ;;  %1778 = sbr.rel (%p2148_p0) target bundleno = 633 (0x279), region = 48 }
 0x191   : > { %v1773_v56 = vadd.f32 %v1772_v38, %v1751_v48 }
 0x193   : > { %1774 = vst [vmem:[#allocation2] sm:$0x1] %v1773_v56 }
 0x194   : > { %v1796_v23 = vld [vmem:[%s3307_s3 + $0x78] sm:$0xff]  ;;  %v2629_v7 = vmov 0.0   ;;  %v1795_v59 = vld [vmem:[%s3307_s3 + $0x70] sm:$0xff]  ;;  %vm2630_vm2 = vmmov 0   ;;  %v1794_v40 = vld [vmem:[%s3307_s3 + $0x68] sm:$0xff] }
 0x195   : > { %2412 = vmatprep.subr.mxu0 %v2629_v7  ;;  %2444 = vmatprep.mubr.msk.f32.mxu0 %vm2630_vm2, %v2629_v7  ;;  %v1793_v0 = vld [vmem:[%s3307_s3 + $0x60] sm:$0xff]  ;;  %v1792_v28 = vld [vmem:[%s3307_s3 + $0x58] sm:$0xff]  ;;  %v1791_v50 = vld [vmem:[%s3307_s3 + $0x50] sm:$0xff] }
 0x196   : > { %2413 = vmatpush3.msra.mxu0 %v1796_v23  ;;  %v1790_v51 = vld [vmem:[%s3307_s3 + $0x48] sm:$0xff]  ;;  %v1789_v13 = vld [vmem:[%s3307_s3 + $0x40] sm:$0xff]  ;;  %v1788_v27 = vld [vmem:[%s3307_s3 + $0x38] sm:$0xff] }
 0x197   : > { %2414 = vmatprep.subr.mxu0 %v2629_v7  ;;  %v1787_v17 = vld [vmem:[%s3307_s3 + $0x30] sm:$0xff]  ;;  %v1786_v53 = vld [vmem:[%s3307_s3 + $0x28] sm:$0xff]  ;;  %v1785_v26 = vld [vmem:[%s3307_s3 + $0x20] sm:$0xff] }
 0x198   : > { %2415 = vmatpush3.msra.mxu0 %v1795_v59  ;;  %v1784_v63 = vld [vmem:[%s3307_s3 + $0x18] sm:$0xff]  ;;  %v1783_v35 = vld [vmem:[%s3307_s3 + $0x10] sm:$0xff]  ;;  %v1782_v24 = vld [vmem:[%s3307_s3 + $0x8] sm:$0xff] }
 0x199   : > { %2416 = vmatprep.subr.mxu0 %v2629_v7  ;;  %v1781_v31 = vld [vmem:[%s3307_s3] sm:$0xff] }
 0x19a   : > { %2417 = vmatpush3.msra.mxu0 %v1794_v40  ;;  %v1779_v54 = vld [vmem:[#allocation2] sm:$0x1] }
 0x19b   : > { %2418 = vmatprep.subr.mxu0 %v2629_v7  ;;  %v1780_v15 = vmul.f32 0.00390625, %v1779_v54  ;;  %v1797_v12 = vld [vmem:[%s3308_s4] sm:$0x1] }
 0x19c   : > { %2419 = vmatpush3.msra.mxu0 %v1793_v0 }
 0x19d   : > { %2420 = vmatprep.subr.mxu0 %v2629_v7 }
 0x19e   : > { %2421 = vmatpush3.msra.mxu0 %v1792_v28 }
 0x19f   : > { %2422 = vmatprep.subr.mxu0 %v2629_v7 }
 0x1a0   : > { %2423 = vmatpush3.msra.mxu0 %v1791_v50 }
 0x1a1   : > { %2424 = vmatprep.subr.mxu0 %v2629_v7 }
 0x1a2   : > { %2425 = vmatpush3.msra.mxu0 %v1790_v51 }
 0x1a3   : > { %2426 = vmatprep.subr.mxu0 %v2629_v7 }
 0x1a4   : > { %2427 = vmatpush3.msra.mxu0 %v1789_v13 }
 0x1a5   : > { %2428 = vmatprep.subr.mxu0 %v2629_v7 }
 0x1a6   : > { %2429 = vmatpush3.msra.mxu0 %v1788_v27 }
 0x1a7   : > { %2430 = vmatprep.subr.mxu0 %v2629_v7 }
 0x1a8   : > { %2431 = vmatpush3.msra.mxu0 %v1787_v17 }
 0x1a9   : > { %2432 = vmatprep.subr.mxu0 %v2629_v7 }
 0x1aa   : > { %2433 = vmatpush3.msra.mxu0 %v1786_v53 }
 0x1ab   : > { %2434 = vmatprep.subr.mxu0 %v2629_v7 }
 0x1ac   : > { %2435 = vmatpush3.msra.mxu0 %v1785_v26 }
 0x1ad   : > { %2436 = vmatprep.subr.mxu0 %v2629_v7 }
 0x1ae   : > { %2437 = vmatpush3.msra.mxu0 %v1784_v63 }
 0x1af   : > { %2438 = vmatprep.subr.mxu0 %v2629_v7 }
 0x1b0   : > { %2439 = vmatpush3.msra.mxu0 %v1783_v35 }
 0x1b1   : > { %2440 = vmatprep.subr.mxu0 %v2629_v7 }
 0x1b2   : > { %2441 = vmatpush3.msra.mxu0 %v1782_v24 }
 0x1b3   : > { %2442 = vmatprep.subr.mxu0 %v2629_v7 }
 0x1b4   : > { %2443 = vmatpush3.msra.mxu0 %v1781_v31 }
 0x1b5   : > { %2445 = vmatmul.mubr.f32.vlgmr.msra.gmra.mxu0 %v1780_v15 }
 0x275   : > { %v1864_v58 = vpop.f32.mrf.mxu0 }
 0x276   : > { %v1865_v47 = vadd.f32 %v1864_v58, %v1797_v12 }
 0x277   : > { %v2446_v37 = vpop.f32.mrf.mxu0 }
 0x278   : > { %1868 = vst [vmem:[%s2739_s16] sm:$0x1] %v1865_v47 }
 0x279 PF: > { %s2149_s7 = sshll.u32 %s2614_s22, 4  ;;  %s1882_s14 = sshll.u32 %s2739_s16, 4  ;;  %s1883_s14 = int_to_ptr.vmem [resolvable:$true] %s1882_s14 }
 0x27a   : > { %s1880_s12 = scalar_lea.hbm %s3309_s5, %s2149_s7  ;;  %s1870_s21 = scalar_lea.sflag [#allocation4], %s227_s10 }
 0x27b   : > { %s2534_s15 = scalar_lea.vmem %s1883_s14, 16  ;;  %s2631_s17 = smov [#allocation3]  }
 0x27c   : > { %p2535_p1 = scmp.ne.s32.totalorder %s1883_s14, %s2534_s15  ;;  %s2538_s13 = sshll.u32 %s2631_s17, 4  ;;  %s2539_s13 = int_to_ptr.vmem [resolvable:$false] %s2538_s13 }
 0x27d   : > { %s2540_s26 = scalar_lea.vmem %s2539_s13, 32  ;;  %p2541_p5 = scmp.lt.s32.totalorder %s1883_s14, %s2539_s13 }
 0x27e   : > { %p2536_p2 = pnand %p2535_p1, %p2711_p3  ;;  %p2542_p6 = scmp.lt.s32.totalorder %s2540_s26, %s2534_s15 }
 0x280   : > { %p2537_p4 = pneg %p2536_p2  ;;  %p2543_p7 = por %p2542_p6, %p2541_p5 }
 0x282   : > { %p2544_p8 = pnand %p2543_p7, %p2537_p4 }
 0x284   : > { %2547 = shalt.err (!%p2544_p8)
}
 0x285   : > { %s2548_s22 = scalar_lea.hbm %s1880_s12, 16  ;;  %s2552_s27 = scalar_lea.hbm %s3309_s5, 32 }
 0x286   : > { %p2549_p10 = scmp.ne.s32.totalorder %s1880_s12, %s2548_s22  ;;  %p2553_p13 = scmp.lt.s32.totalorder %s1880_s12, %s3309_s5 }
 0x287   : > { %p2554_p0 = scmp.lt.s32.totalorder %s2552_s27, %s2548_s22 }
 0x288   : > { %p2550_p11 = pnand %p2549_p10, %p2711_p3 }
 0x289   : > { %p2555_p1 = por %p2554_p0, %p2553_p13 }
 0x28a   : > { %p2551_p12 = pneg %p2550_p11 }
 0x28c   : > { %p2556_p2 = pnand %p2555_p1, %p2551_p12 }
 0x28e   : > { %2559 = shalt.err (!%p2556_p2)
}
 0x28f   : > { %2460 = dma.vmem_to_hbm [thread:$0]  (%p2711_p3), %s1883_s14, 16, %s1880_s12, %s1870_s21  }
 0x290 PF: > { %p2466_p4 = scmp.ge.s32.totalorder %s2626_s25, 2  ;;  %s1894_s11 = sand.u32 1, %s2598_s18  }
 0x291   : > { %s1895_s15 = scalar_lea.sflag [#allocation4], %s1894_s11 }
 0x292   : > { %p2463_p5 = pnand %p2466_p4, %p2721_p9 }
 0x294   : > { %p2464_p6 = pneg %p2463_p5 }
 0x296   : > { %2593 = dma.done.wait (%p2464_p6), %s1895_s15, 16  }
 0x297   : > { %2595 = vsyncadd (%p2464_p6), %s1895_s15, 4294967280  ;;  %s18_s25 = sadd.s32 1, %s2626_s25   ;;  %s3344_s18 = smov %s2602_s19 }
 0x298   : > { %p15_p7 = scmp.ge.s32.totalorder %s18_s25, 6   ;;  %s3345_s19 = smov %s2606_s20 }
 0x299   : > { %s3346_s20 = smov %s2729_s9  ;;  %s3347_s21 = smov %s2618_s23 }
 0x29a   : > { %s3348_s22 = smov %s2622_s24  ;;  %s3349_s23 = smov %s3352_s28 }
 0x29b   : > { %s3350_s24 = smov %s3356_s29  ;;  %17 = sbr.rel (!%p15_p7) target bundleno = 5 (0x5), region = 94 }
 0x2a0   :  { %1899 = vsyncpa [#allocation4], 1 }
 0x2a1   :  { %1901 = vsyncpa [#allocation4 + $0x1], 1 }

</bundles_post_ra>
